<compile_context>
chip_gen: v7x
topology: tpu7x:2x2x1
jax: 0.10.0
libtpu: 0.0.40
codegen_flags: <defaults>
</compile_context>

<pallas_src>
import jax
import jax.numpy as jnp
from jax import lax
from jax.experimental import pallas as pl
from jax.experimental.pallas import tpu as pltpu


def _bilstm_kernel(xcat_ref, mf_ref, mb_ref, wx_ref, wh_ref, b_ref,
                   wtag_ref, btag_ref, out_ref,
                   gx_buf, hf_buf, hb_buf, m_buf):
    """Bidirectional LSTM + hidden2tag + mask for one batch block.

    xcat_ref : (T, BB, 2E)   rows are [x[t] | x[T-1-t]]  (fwd / bwd inputs)
    mf_ref   : (T, BB, 1)    mask[t]
    mb_ref   : (T, BB, 1)    mask[T-1-t]
    wx_ref   : (2E, 8*H2)    input->gate weights, gate-major columns
                             [i_f i_b f_f f_b g_f g_b o_f o_b]
    wh_ref   : (2H2, 8*H2)   block-diagonal hidden->gate weights (same layout)
    b_ref    : (1, 8*H2)     b_ih + b_hh for both directions, gate-major
    wtag_ref : (2H2, NTP)    hidden2tag weights, zero-padded to 128 lanes
    btag_ref : (1, NTP)
    out_ref  : (T, BB, NTP)
    """
    T, BB, E2 = xcat_ref.shape
    H2 = hf_buf.shape[-1]
    G = 2 * H2

    # One-shot input projection for all timesteps & both directions (single
    # big MXU pass over T*BB rows), with biases folded in.
    xc = xcat_ref[...].reshape(T * BB, E2)
    gx = jnp.dot(xc, wx_ref[...], preferred_element_type=jnp.float32) + b_ref[...]
    gx_buf[...] = gx.reshape(T, BB, 8 * H2)

    # Per-step state-update gate: fwd half follows mask[t], bwd half mask[T-1-t].
    m_buf[...] = jnp.concatenate(
        [jnp.broadcast_to(mf_ref[...], (T, BB, H2)),
         jnp.broadcast_to(mb_ref[...], (T, BB, H2))], axis=-1)

    wh = wh_ref[...]

    def step(s, carry):
        h, c = carry                                  # (BB, 2H2): [fwd | bwd]
        # One fused 128-lane recurrent matmul per step for both directions.
        g = gx_buf[s] + jnp.dot(h, wh, preferred_element_type=jnp.float32)
        i = jax.nn.sigmoid(g[:, 0 * G:1 * G])
        f = jax.nn.sigmoid(g[:, 1 * G:2 * G])
        gg = jnp.tanh(g[:, 2 * G:3 * G])
        o = jax.nn.sigmoid(g[:, 3 * G:4 * G])
        c_new = f * c + i * gg
        h_new = o * jnp.tanh(c_new)
        # pack_padded semantics: fwd state freezes past the length, bwd state
        # stays at 0 until the sequence's last valid token is reached.
        m = m_buf[s]
        h = m * h_new + (1.0 - m) * h
        c = m * c_new + (1.0 - m) * c
        hf_buf[s] = h[:, :H2]                         # fwd output at time s
        hb_buf[T - 1 - s] = h[:, H2:]                 # bwd output at time T-1-s
        return (h, c)

    zeros = jnp.zeros((BB, 2 * H2), jnp.float32)
    lax.fori_loop(0, T, step, (zeros, zeros), unroll=True)

    # Fused hidden2tag over all T*BB rows at once; lane-dense (128-wide) store.
    h_all = jnp.concatenate([hf_buf[...], hb_buf[...]], axis=-1)   # (T,BB,2H2)
    tags = (jnp.dot(h_all.reshape(T * BB, 2 * H2), wtag_ref[...],
                    preferred_element_type=jnp.float32) + btag_ref[...])
    tags = tags * mf_ref[...].reshape(T * BB, 1)
    out_ref[...] = tags.reshape(T, BB, out_ref.shape[-1])


def _gate_major(a, h2):
    """Reorder last dim from [fwd i,f,g,o | bwd i,f,g,o] to gate-major order."""
    lead = a.shape[:-1]
    a = a.reshape(lead + (2, 4, h2))
    a = jnp.swapaxes(a, -3, -2)
    return a.reshape(lead + (8 * h2,))


def bilstm_forward(inp_embed, mask, params, pad_id=0, batch_block=8):
    """Matches BiLSTM.forward(inp_embed, mask).

    inp_embed: (B, T, E) float32, mask: (B, T) {0,1}. Returns (B, T, num_tag).
    pad_id only affects positions zeroed by the mask multiply, so it is unused.
    """
    del pad_id
    inp_embed = inp_embed.astype(jnp.float32)
    mask_f = mask.astype(jnp.float32)
    B, T, E = inp_embed.shape
    H2 = params['W_hh_f'].shape[1]
    num_tag = params['W_tag'].shape[0]
    NTP = max(128, -(-num_tag // 128) * 128)            # lane-dense output width

    BB = batch_block
    BP = -(-B // BB) * BB                                # pad batch to 8-sublane blocks
    x = jnp.pad(inp_embed, ((0, BP - B), (0, 0), (0, 0)))
    mk = jnp.pad(mask_f, ((0, BP - B), (0, 0)))

    # Glue (XLA side): time-major inputs; backward direction consumes the
    # time-reversed rows, concatenated along features so the kernel does a
    # single input projection.
    x_tbe = jnp.transpose(x, (1, 0, 2))                  # (T, BP, E)
    x_cat = jnp.concatenate([x_tbe, x_tbe[::-1]], axis=-1)   # (T, BP, 2E)
    mf = jnp.transpose(mk, (1, 0))[:, :, None]           # (T, BP, 1)
    mb = mf[::-1]

    # Weights: fold b_ih+b_hh, build block input/recurrent weights, reorder to
    # gate-major columns, pad hidden2tag to 128 output lanes.
    # TODO(synk): on v6e/v7x cast these (and the gate scratch) to bf16 with f32
    # accumulation to halve VMEM/DMA; kept f32 here for exact reference match.
    zx = jnp.zeros((E, 4 * H2), jnp.float32)
    w_x = jnp.concatenate(
        [jnp.concatenate([params['W_ih_f'].T, zx], axis=1),
         jnp.concatenate([zx, params['W_ih_b'].T], axis=1)], axis=0)  # (2E, 8H2)
    zh = jnp.zeros((H2, 4 * H2), jnp.float32)
    w_h = jnp.concatenate(
        [jnp.concatenate([params['W_hh_f'].T, zh], axis=1),
         jnp.concatenate([zh, params['W_hh_b'].T], axis=1)], axis=0)  # (2H2, 8H2)
    b = jnp.concatenate([params['b_ih_f'] + params['b_hh_f'],
                         params['b_ih_b'] + params['b_hh_b']])
    w_x = _gate_major(w_x, H2)
    w_h = _gate_major(w_h, H2)
    b = _gate_major(b, H2)[None, :]
    w_tag = jnp.pad(params['W_tag'].T, ((0, 0), (0, NTP - num_tag)))  # (2H2, NTP)
    b_tag = jnp.pad(params['b_tag'], (0, NTP - num_tag))[None, :]     # (1, NTP)

    out = pl.pallas_call(
        _bilstm_kernel,
        out_shape=jax.ShapeDtypeStruct((T, BP, NTP), jnp.float32),
        grid=(BP // BB,),
        in_specs=[
            pl.BlockSpec((T, BB, 2 * E), lambda bidx: (0, bidx, 0)),
            pl.BlockSpec((T, BB, 1), lambda bidx: (0, bidx, 0)),
            pl.BlockSpec((T, BB, 1), lambda bidx: (0, bidx, 0)),
            pl.BlockSpec((2 * E, 8 * H2), lambda bidx: (0, 0)),
            pl.BlockSpec((2 * H2, 8 * H2), lambda bidx: (0, 0)),
            pl.BlockSpec((1, 8 * H2), lambda bidx: (0, 0)),
            pl.BlockSpec((2 * H2, NTP), lambda bidx: (0, 0)),
            pl.BlockSpec((1, NTP), lambda bidx: (0, 0)),
        ],
        out_specs=pl.BlockSpec((T, BB, NTP), lambda bidx: (0, bidx, 0)),
        scratch_shapes=[
            pltpu.VMEM((T, BB, 8 * H2), jnp.float32),   # input-projected gates
            pltpu.VMEM((T, BB, H2), jnp.float32),       # fwd hidden states
            pltpu.VMEM((T, BB, H2), jnp.float32),       # bwd hidden states
            pltpu.VMEM((T, BB, 2 * H2), jnp.float32),   # per-step update gates
        ],
        compiler_params=pltpu.CompilerParams(
            dimension_semantics=("parallel",)),         # batch blocks across cores
    )(x_cat, mf, mb, w_x, w_h, b, w_tag, b_tag)

    return jnp.transpose(out, (1, 0, 2))[:B, :, :num_tag]


def reference_bilstm(inp_embed, mask, params):
    """Pure-JAX reference reproducing the PyTorch module forward."""
    inp_embed = inp_embed.astype(jnp.float32)
    mask_f = mask.astype(jnp.float32)
    B, T, E = inp_embed.shape
    H2 = params['W_hh_f'].shape[1]
    lengths = jnp.sum(mask_f, axis=1).astype(jnp.int32)

    def run_dir(x_bte, Wih, Whh, bih, bhh):
        def cell(carry, x_t):
            h, c = carry
            g = x_t @ Wih.T + h @ Whh.T + bih + bhh
            i, f, gg, o = jnp.split(g, 4, axis=-1)
            i = jax.nn.sigmoid(i)
            f = jax.nn.sigmoid(f)
            gg = jnp.tanh(gg)
            o = jax.nn.sigmoid(o)
            c = f * c + i * gg
            h = o * jnp.tanh(c)
            return (h, c), h

        h0 = jnp.zeros((B, H2), jnp.float32)
        _, hs = lax.scan(cell, (h0, h0), jnp.swapaxes(x_bte, 0, 1))
        return jnp.swapaxes(hs, 0, 1)                     # (B, T, H2)

    hf = run_dir(inp_embed, params['W_ih_f'], params['W_hh_f'],
                 params['b_ih_f'], params['b_hh_f'])

    t_idx = jnp.arange(T)
    idx = jnp.clip(lengths[:, None] - 1 - t_idx[None, :], 0, T - 1)  # (B, T)
    valid = (t_idx[None, :] < lengths[:, None]).astype(jnp.float32)
    x_rev = jnp.take_along_axis(inp_embed, idx[:, :, None], axis=1) * valid[:, :, None]
    hb_rev = run_dir(x_rev, params['W_ih_b'], params['W_hh_b'],
                     params['b_ih_b'], params['b_hh_b'])
    hb = jnp.take_along_axis(hb_rev, idx[:, :, None], axis=1) * valid[:, :, None]

    h = jnp.concatenate([hf, hb], axis=-1)
    tag = h @ params['W_tag'].T + params['b_tag']
    return tag * mask_f[:, :, None]


if __name__ == "__main__":
    # Small shapes consistent with the module: batch=2, seq=8, embedding=32,
    # hidden_dim=32 (16 per direction), num_tag=5.
    B, T, E = 2, 8, 32
    hidden_dim = 32
    H2 = hidden_dim // 2
    num_tag = 5

    key = jax.random.PRNGKey(0)
    keys = jax.random.split(key, 12)

    def uniform(k, shape, scale):
        return jax.random.uniform(k, shape, jnp.float32, -scale, scale)

    s_lstm = 1.0 / (H2 ** 0.5)
    s_lin = 1.0 / (hidden_dim ** 0.5)
    params = {
        'W_ih_f': uniform(keys[0], (4 * H2, E), s_lstm),
        'W_hh_f': uniform(keys[1], (4 * H2, H2), s_lstm),
        'b_ih_f': uniform(keys[2], (4 * H2,), s_lstm),
        'b_hh_f': uniform(keys[3], (4 * H2,), s_lstm),
        'W_ih_b': uniform(keys[4], (4 * H2, E), s_lstm),
        'W_hh_b': uniform(keys[5], (4 * H2, H2), s_lstm),
        'b_ih_b': uniform(keys[6], (4 * H2,), s_lstm),
        'b_hh_b': uniform(keys[7], (4 * H2,), s_lstm),
        'W_tag': uniform(keys[8], (num_tag, hidden_dim), s_lin),
        'b_tag': uniform(keys[9], (num_tag,), s_lin),
    }

    inp_embed = jax.random.normal(keys[10], (B, T, E), jnp.float32)
    # Lengths sorted descending (pack_padded_sequence enforce_sorted=True).
    seq_lengths = jnp.array([8, 5], dtype=jnp.int32)
    mask = (jnp.arange(T)[None, :] < seq_lengths[:, None]).astype(jnp.float32)

    out = bilstm_forward(inp_embed, mask, params, pad_id=0)
    out = jax.block_until_ready(out)
    assert out.shape == (B, T, num_tag), out.shape

    ref = jax.block_until_ready(reference_bilstm(inp_embed, mask, params))
    if not jnp.allclose(out, ref, atol=1e-3, rtol=1e-3):
        raise AssertionError(
            f"mismatch vs reference, max abs err = {float(jnp.max(jnp.abs(out - ref)))}")

    print("KERNEL_OK")
</pallas_src>

<mosaic_0001>
module attributes {stable_mosaic.version = 11 : i64} {
  func.func @_bilstm_kernel(%arg0: i32, %arg1: memref<8x8x64xf32, #tpu.memory_space<vmem>>, %arg2: memref<8x8x1xf32, #tpu.memory_space<vmem>>, %arg3: memref<8x8x1xf32, #tpu.memory_space<vmem>>, %arg4: memref<64x128xf32, #tpu.memory_space<vmem>>, %arg5: memref<32x128xf32, #tpu.memory_space<vmem>>, %arg6: memref<1x128xf32, #tpu.memory_space<vmem>>, %arg7: memref<32x128xf32, #tpu.memory_space<vmem>>, %arg8: memref<1x128xf32, #tpu.memory_space<vmem>>, %arg9: memref<8x8x128xf32, #tpu.memory_space<vmem>>, %arg10: memref<8x8x128xf32, #tpu.memory_space<vmem>>, %arg11: memref<8x8x16xf32, #tpu.memory_space<vmem>>, %arg12: memref<8x8x16xf32, #tpu.memory_space<vmem>>, %arg13: memref<8x8x32xf32, #tpu.memory_space<vmem>>) attributes {dimension_semantics = [#tpu.dimension_semantics<parallel>], iteration_bounds = array<i64: 1>, scalar_prefetch = 0 : i64, scratch_operands = 4 : i64, tpu.core_type = #tpu.core_type<tc>, window_params = [{transform_indices = @transform_0, window_bounds = array<i64: 8, 8, 64>}, {transform_indices = @transform_1, window_bounds = array<i64: 8, 8, 1>}, {transform_indices = @transform_2, window_bounds = array<i64: 8, 8, 1>}, {pipeline_mode = #tpu.pipeline_mode<synchronous>, transform_indices = @transform_3, window_bounds = array<i64: 64, 128>}, {pipeline_mode = #tpu.pipeline_mode<synchronous>, transform_indices = @transform_4, window_bounds = array<i64: 32, 128>}, {pipeline_mode = #tpu.pipeline_mode<synchronous>, transform_indices = @transform_5, window_bounds = array<i64: 1, 128>}, {pipeline_mode = #tpu.pipeline_mode<synchronous>, transform_indices = @transform_6, window_bounds = array<i64: 32, 128>}, {pipeline_mode = #tpu.pipeline_mode<synchronous>, transform_indices = @transform_7, window_bounds = array<i64: 1, 128>}, {transform_indices = @transform_8, window_bounds = array<i64: 8, 8, 128>}]} {
    %c0 = arith.constant 0 : index
    %c0_0 = arith.constant 0 : index
    %c0_1 = arith.constant 0 : index
    %0 = vector.load %arg1[%c0, %c0_0, %c0_1] : memref<8x8x64xf32, #tpu.memory_space<vmem>>, vector<8x8x64xf32>
    %1 = vector.shape_cast %0 : vector<8x8x64xf32> to vector<64x64xf32>
    %c0_2 = arith.constant 0 : index
    %c0_3 = arith.constant 0 : index
    %2 = vector.load %arg4[%c0_2, %c0_3] : memref<64x128xf32, #tpu.memory_space<vmem>>, vector<64x128xf32>
    %cst = arith.constant dense<0.000000e+00> : vector<64x128xf32>
    %3 = tpu.matmul %1, %2, %cst {dimension_numbers = #tpu.dot_dimension_numbers<[1], [0], [0], [1], [0, 0, 1, 1], [], []>} : vector<64x64xf32>, vector<64x128xf32>, vector<64x128xf32> -> vector<64x128xf32>
    %c0_4 = arith.constant 0 : index
    %c0_5 = arith.constant 0 : index
    %4 = vector.load %arg6[%c0_4, %c0_5] : memref<1x128xf32, #tpu.memory_space<vmem>>, vector<1x128xf32>
    %5 = vector.broadcast %4 : vector<1x128xf32> to vector<64x128xf32>
    %6 = arith.addf %3, %5 : vector<64x128xf32>
    %7 = vector.shape_cast %6 : vector<64x128xf32> to vector<8x8x128xf32>
    %c0_6 = arith.constant 0 : index
    %c0_7 = arith.constant 0 : index
    %c0_8 = arith.constant 0 : index
    %8 = vector.load %arg10[%c0_6, %c0_7, %c0_8] : memref<8x8x128xf32, #tpu.memory_space<vmem>>, vector<8x8x128xf32>
    tpu.vector_store %arg10[%c0_6, %c0_7, %c0_8], %7 {strides = array<i32>} : memref<8x8x128xf32, #tpu.memory_space<vmem>>, vector<8x8x128xf32>,
    %c0_9 = arith.constant 0 : index
    %c0_10 = arith.constant 0 : index
    %c0_11 = arith.constant 0 : index
    %9 = vector.load %arg2[%c0_9, %c0_10, %c0_11] : memref<8x8x1xf32, #tpu.memory_space<vmem>>, vector<8x8x1xf32>
    %10 = vector.shape_cast %9 : vector<8x8x1xf32> to vector<8x8x1xf32>
    %11 = vector.broadcast %10 : vector<8x8x1xf32> to vector<8x8x16xf32>
    %c0_12 = arith.constant 0 : index
    %c0_13 = arith.constant 0 : index
    %c0_14 = arith.constant 0 : index
    %12 = vector.load %arg3[%c0_12, %c0_13, %c0_14] : memref<8x8x1xf32, #tpu.memory_space<vmem>>, vector<8x8x1xf32>
    %13 = vector.shape_cast %12 : vector<8x8x1xf32> to vector<8x8x1xf32>
    %14 = vector.broadcast %13 : vector<8x8x1xf32> to vector<8x8x16xf32>
    %15 = tpu.concatenate %11, %14 in 2 : vector<8x8x16xf32>, vector<8x8x16xf32> -> vector<8x8x32xf32>
    %c0_15 = arith.constant 0 : index
    %c0_16 = arith.constant 0 : index
    %c0_17 = arith.constant 0 : index
    %16 = vector.load %arg13[%c0_15, %c0_16, %c0_17] : memref<8x8x32xf32, #tpu.memory_space<vmem>>, vector<8x8x32xf32>
    tpu.vector_store %arg13[%c0_15, %c0_16, %c0_17], %15 {strides = array<i32>} : memref<8x8x32xf32, #tpu.memory_space<vmem>>, vector<8x8x32xf32>,
    %c0_18 = arith.constant 0 : index
    %c0_19 = arith.constant 0 : index
    %17 = vector.load %arg5[%c0_18, %c0_19] : memref<32x128xf32, #tpu.memory_space<vmem>>, vector<32x128xf32>
    %cst_20 = arith.constant 0.000000e+00 : f32
    %18 = vector.broadcast %cst_20 : f32 to vector<8x32xf32>
    %c0_i32 = arith.constant 0 : i32
    %19 = arith.index_cast %c0_i32 : i32 to index
    %c0_21 = arith.constant 0 : index
    %c0_22 = arith.constant 0 : index
    %20 = vector.load %arg10[%19, %c0_21, %c0_22] : memref<8x8x128xf32, #tpu.memory_space<vmem>>, vector<1x8x128xf32>
    %21 = vector.shape_cast %20 : vector<1x8x128xf32> to vector<8x128xf32>
    %cst_23 = arith.constant dense<0.000000e+00> : vector<8x128xf32>
    %22 = tpu.matmul %18, %17, %cst_23 {dimension_numbers = #tpu.dot_dimension_numbers<[1], [0], [0], [1], [0, 0, 1, 1], [], []>} : vector<8x32xf32>, vector<32x128xf32>, vector<8x128xf32> -> vector<8x128xf32>
    %23 = arith.addf %21, %22 : vector<8x128xf32>
    %24 = vector.extract_strided_slice %23 {offsets = [0, 0], sizes = [8, 32], strides = [1, 1]} : vector<8x128xf32> to vector<8x32xf32>
    %25 = arith.negf %24 : vector<8x32xf32>
    %26 = math.exp %25 : vector<8x32xf32>
    %cst_24 = arith.constant 1.000000e+00 : f32
    %27 = vector.broadcast %cst_24 : f32 to vector<8x32xf32>
    %28 = arith.addf %27, %26 : vector<8x32xf32>
    %29 = arith.divf %27, %28 : vector<8x32xf32>
    %30 = vector.extract_strided_slice %23 {offsets = [0, 32], sizes = [8, 32], strides = [1, 1]} : vector<8x128xf32> to vector<8x32xf32>
    %31 = arith.negf %30 : vector<8x32xf32>
    %32 = math.exp %31 : vector<8x32xf32>
    %cst_25 = arith.constant 1.000000e+00 : f32
    %33 = vector.broadcast %cst_25 : f32 to vector<8x32xf32>
    %34 = arith.addf %33, %32 : vector<8x32xf32>
    %35 = arith.divf %33, %34 : vector<8x32xf32>
    %36 = vector.extract_strided_slice %23 {offsets = [0, 64], sizes = [8, 32], strides = [1, 1]} : vector<8x128xf32> to vector<8x32xf32>
    %37 = math.tanh %36 : vector<8x32xf32>
    %38 = vector.extract_strided_slice %23 {offsets = [0, 96], sizes = [8, 32], strides = [1, 1]} : vector<8x128xf32> to vector<8x32xf32>
    %39 = arith.negf %38 : vector<8x32xf32>
    %40 = math.exp %39 : vector<8x32xf32>
    %cst_26 = arith.constant 1.000000e+00 : f32
    %41 = vector.broadcast %cst_26 : f32 to vector<8x32xf32>
    %42 = arith.addf %41, %40 : vector<8x32xf32>
    %43 = arith.divf %41, %42 : vector<8x32xf32>
    %44 = arith.mulf %35, %18 : vector<8x32xf32>
    %45 = arith.mulf %29, %37 : vector<8x32xf32>
    %46 = arith.addf %44, %45 : vector<8x32xf32>
    %47 = math.tanh %46 : vector<8x32xf32>
    %48 = arith.mulf %43, %47 : vector<8x32xf32>
    %49 = arith.index_cast %c0_i32 : i32 to index
    %c0_27 = arith.constant 0 : index
    %c0_28 = arith.constant 0 : index
    %50 = vector.load %arg13[%49, %c0_27, %c0_28] : memref<8x8x32xf32, #tpu.memory_space<vmem>>, vector<1x8x32xf32>
    %51 = vector.shape_cast %50 : vector<1x8x32xf32> to vector<8x32xf32>
    %52 = arith.mulf %51, %48 : vector<8x32xf32>
    %cst_29 = arith.constant 1.000000e+00 : f32
    %53 = vector.broadcast %cst_29 : f32 to vector<8x32xf32>
    %54 = arith.subf %53, %51 : vector<8x32xf32>
    %55 = arith.mulf %54, %18 : vector<8x32xf32>
    %56 = arith.addf %52, %55 : vector<8x32xf32>
    %57 = arith.mulf %51, %46 : vector<8x32xf32>
    %cst_30 = arith.constant 1.000000e+00 : f32
    %58 = vector.broadcast %cst_30 : f32 to vector<8x32xf32>
    %59 = arith.subf %58, %51 : vector<8x32xf32>
    %60 = arith.mulf %59, %18 : vector<8x32xf32>
    %61 = arith.addf %57, %60 : vector<8x32xf32>
    %62 = vector.extract_strided_slice %56 {offsets = [0, 0], sizes = [8, 16], strides = [1, 1]} : vector<8x32xf32> to vector<8x16xf32>
    %63 = arith.index_cast %c0_i32 : i32 to index
    %c0_31 = arith.constant 0 : index
    %c0_32 = arith.constant 0 : index
    %64 = vector.load %arg11[%63, %c0_31, %c0_32] : memref<8x8x16xf32, #tpu.memory_space<vmem>>, vector<1x8x16xf32>
    %65 = vector.shape_cast %64 : vector<1x8x16xf32> to vector<8x16xf32>
    %66 = vector.shape_cast %62 : vector<8x16xf32> to vector<1x8x16xf32>
    tpu.vector_store %arg11[%63, %c0_31, %c0_32], %66 {strides = array<i32>} : memref<8x8x16xf32, #tpu.memory_space<vmem>>, vector<1x8x16xf32>,
    %67 = vector.extract_strided_slice %56 {offsets = [0, 16], sizes = [8, 16], strides = [1, 1]} : vector<8x32xf32> to vector<8x16xf32>
    %c7_i32 = arith.constant 7 : i32
    %68 = arith.subi %c7_i32, %c0_i32 : i32
    %69 = arith.index_cast %68 : i32 to index
    %c0_33 = arith.constant 0 : index
    %c0_34 = arith.constant 0 : index
    %70 = vector.load %arg12[%69, %c0_33, %c0_34] : memref<8x8x16xf32, #tpu.memory_space<vmem>>, vector<1x8x16xf32>
    %71 = vector.shape_cast %70 : vector<1x8x16xf32> to vector<8x16xf32>
    %72 = vector.shape_cast %67 : vector<8x16xf32> to vector<1x8x16xf32>
    tpu.vector_store %arg12[%69, %c0_33, %c0_34], %72 {strides = array<i32>} : memref<8x8x16xf32, #tpu.memory_space<vmem>>, vector<1x8x16xf32>,
    %c1_i32 = arith.constant 1 : i32
    %73 = arith.index_cast %c1_i32 : i32 to index
    %c0_35 = arith.constant 0 : index
    %c0_36 = arith.constant 0 : index
    %74 = vector.load %arg10[%73, %c0_35, %c0_36] : memref<8x8x128xf32, #tpu.memory_space<vmem>>, vector<1x8x128xf32>
    %75 = vector.shape_cast %74 : vector<1x8x128xf32> to vector<8x128xf32>
    %cst_37 = arith.constant dense<0.000000e+00> : vector<8x128xf32>
    %76 = tpu.matmul %56, %17, %cst_37 {dimension_numbers = #tpu.dot_dimension_numbers<[1], [0], [0], [1], [0, 0, 1, 1], [], []>} : vector<8x32xf32>, vector<32x128xf32>, vector<8x128xf32> -> vector<8x128xf32>
    %77 = arith.addf %75, %76 : vector<8x128xf32>
    %78 = vector.extract_strided_slice %77 {offsets = [0, 0], sizes = [8, 32], strides = [1, 1]} : vector<8x128xf32> to vector<8x32xf32>
    %79 = arith.negf %78 : vector<8x32xf32>
    %80 = math.exp %79 : vector<8x32xf32>
    %cst_38 = arith.constant 1.000000e+00 : f32
    %81 = vector.broadcast %cst_38 : f32 to vector<8x32xf32>
    %82 = arith.addf %81, %80 : vector<8x32xf32>
    %83 = arith.divf %81, %82 : vector<8x32xf32>
    %84 = vector.extract_strided_slice %77 {offsets = [0, 32], sizes = [8, 32], strides = [1, 1]} : vector<8x128xf32> to vector<8x32xf32>
    %85 = arith.negf %84 : vector<8x32xf32>
    %86 = math.exp %85 : vector<8x32xf32>
    %cst_39 = arith.constant 1.000000e+00 : f32
    %87 = vector.broadcast %cst_39 : f32 to vector<8x32xf32>
    %88 = arith.addf %87, %86 : vector<8x32xf32>
    %89 = arith.divf %87, %88 : vector<8x32xf32>
    %90 = vector.extract_strided_slice %77 {offsets = [0, 64], sizes = [8, 32], strides = [1, 1]} : vector<8x128xf32> to vector<8x32xf32>
    %91 = math.tanh %90 : vector<8x32xf32>
    %92 = vector.extract_strided_slice %77 {offsets = [0, 96], sizes = [8, 32], strides = [1, 1]} : vector<8x128xf32> to vector<8x32xf32>
    %93 = arith.negf %92 : vector<8x32xf32>
    %94 = math.exp %93 : vector<8x32xf32>
    %cst_40 = arith.constant 1.000000e+00 : f32
    %95 = vector.broadcast %cst_40 : f32 to vector<8x32xf32>
    %96 = arith.addf %95, %94 : vector<8x32xf32>
    %97 = arith.divf %95, %96 : vector<8x32xf32>
    %98 = arith.mulf %89, %61 : vector<8x32xf32>
    %99 = arith.mulf %83, %91 : vector<8x32xf32>
    %100 = arith.addf %98, %99 : vector<8x32xf32>
    %101 = math.tanh %100 : vector<8x32xf32>
    %102 = arith.mulf %97, %101 : vector<8x32xf32>
    %103 = arith.index_cast %c1_i32 : i32 to index
    %c0_41 = arith.constant 0 : index
    %c0_42 = arith.constant 0 : index
    %104 = vector.load %arg13[%103, %c0_41, %c0_42] : memref<8x8x32xf32, #tpu.memory_space<vmem>>, vector<1x8x32xf32>
    %105 = vector.shape_cast %104 : vector<1x8x32xf32> to vector<8x32xf32>
    %106 = arith.mulf %105, %102 : vector<8x32xf32>
    %cst_43 = arith.constant 1.000000e+00 : f32
    %107 = vector.broadcast %cst_43 : f32 to vector<8x32xf32>
    %108 = arith.subf %107, %105 : vector<8x32xf32>
    %109 = arith.mulf %108, %56 : vector<8x32xf32>
    %110 = arith.addf %106, %109 : vector<8x32xf32>
    %111 = arith.mulf %105, %100 : vector<8x32xf32>
    %cst_44 = arith.constant 1.000000e+00 : f32
    %112 = vector.broadcast %cst_44 : f32 to vector<8x32xf32>
    %113 = arith.subf %112, %105 : vector<8x32xf32>
    %114 = arith.mulf %113, %61 : vector<8x32xf32>
    %115 = arith.addf %111, %114 : vector<8x32xf32>
    %116 = vector.extract_strided_slice %110 {offsets = [0, 0], sizes = [8, 16], strides = [1, 1]} : vector<8x32xf32> to vector<8x16xf32>
    %117 = arith.index_cast %c1_i32 : i32 to index
    %c0_45 = arith.constant 0 : index
    %c0_46 = arith.constant 0 : index
    %118 = vector.load %arg11[%117, %c0_45, %c0_46] : memref<8x8x16xf32, #tpu.memory_space<vmem>>, vector<1x8x16xf32>
    %119 = vector.shape_cast %118 : vector<1x8x16xf32> to vector<8x16xf32>
    %120 = vector.shape_cast %116 : vector<8x16xf32> to vector<1x8x16xf32>
    tpu.vector_store %arg11[%117, %c0_45, %c0_46], %120 {strides = array<i32>} : memref<8x8x16xf32, #tpu.memory_space<vmem>>, vector<1x8x16xf32>,
    %121 = vector.extract_strided_slice %110 {offsets = [0, 16], sizes = [8, 16], strides = [1, 1]} : vector<8x32xf32> to vector<8x16xf32>
    %c7_i32_47 = arith.constant 7 : i32
    %122 = arith.subi %c7_i32_47, %c1_i32 : i32
    %123 = arith.index_cast %122 : i32 to index
    %c0_48 = arith.constant 0 : index
    %c0_49 = arith.constant 0 : index
    %124 = vector.load %arg12[%123, %c0_48, %c0_49] : memref<8x8x16xf32, #tpu.memory_space<vmem>>, vector<1x8x16xf32>
    %125 = vector.shape_cast %124 : vector<1x8x16xf32> to vector<8x16xf32>
    %126 = vector.shape_cast %121 : vector<8x16xf32> to vector<1x8x16xf32>
    tpu.vector_store %arg12[%123, %c0_48, %c0_49], %126 {strides = array<i32>} : memref<8x8x16xf32, #tpu.memory_space<vmem>>, vector<1x8x16xf32>,
    %c2_i32 = arith.constant 2 : i32
    %127 = arith.index_cast %c2_i32 : i32 to index
    %c0_50 = arith.constant 0 : index
    %c0_51 = arith.constant 0 : index
    %128 = vector.load %arg10[%127, %c0_50, %c0_51] : memref<8x8x128xf32, #tpu.memory_space<vmem>>, vector<1x8x128xf32>
    %129 = vector.shape_cast %128 : vector<1x8x128xf32> to vector<8x128xf32>
    %cst_52 = arith.constant dense<0.000000e+00> : vector<8x128xf32>
    %130 = tpu.matmul %110, %17, %cst_52 {dimension_numbers = #tpu.dot_dimension_numbers<[1], [0], [0], [1], [0, 0, 1, 1], [], []>} : vector<8x32xf32>, vector<32x128xf32>, vector<8x128xf32> -> vector<8x128xf32>
    %131 = arith.addf %129, %130 : vector<8x128xf32>
    %132 = vector.extract_strided_slice %131 {offsets = [0, 0], sizes = [8, 32], strides = [1, 1]} : vector<8x128xf32> to vector<8x32xf32>
    %133 = arith.negf %132 : vector<8x32xf32>
    %134 = math.exp %133 : vector<8x32xf32>
    %cst_53 = arith.constant 1.000000e+00 : f32
    %135 = vector.broadcast %cst_53 : f32 to vector<8x32xf32>
    %136 = arith.addf %135, %134 : vector<8x32xf32>
    %137 = arith.divf %135, %136 : vector<8x32xf32>
    %138 = vector.extract_strided_slice %131 {offsets = [0, 32], sizes = [8, 32], strides = [1, 1]} : vector<8x128xf32> to vector<8x32xf32>
    %139 = arith.negf %138 : vector<8x32xf32>
    %140 = math.exp %139 : vector<8x32xf32>
    %cst_54 = arith.constant 1.000000e+00 : f32
    %141 = vector.broadcast %cst_54 : f32 to vector<8x32xf32>
    %142 = arith.addf %141, %140 : vector<8x32xf32>
    %143 = arith.divf %141, %142 : vector<8x32xf32>
    %144 = vector.extract_strided_slice %131 {offsets = [0, 64], sizes = [8, 32], strides = [1, 1]} : vector<8x128xf32> to vector<8x32xf32>
    %145 = math.tanh %144 : vector<8x32xf32>
    %146 = vector.extract_strided_slice %131 {offsets = [0, 96], sizes = [8, 32], strides = [1, 1]} : vector<8x128xf32> to vector<8x32xf32>
    %147 = arith.negf %146 : vector<8x32xf32>
    %148 = math.exp %147 : vector<8x32xf32>
    %cst_55 = arith.constant 1.000000e+00 : f32
    %149 = vector.broadcast %cst_55 : f32 to vector<8x32xf32>
    %150 = arith.addf %149, %148 : vector<8x32xf32>
    %151 = arith.divf %149, %150 : vector<8x32xf32>
    %152 = arith.mulf %143, %115 : vector<8x32xf32>
    %153 = arith.mulf %137, %145 : vector<8x32xf32>
    %154 = arith.addf %152, %153 : vector<8x32xf32>
    %155 = math.tanh %154 : vector<8x32xf32>
    %156 = arith.mulf %151, %155 : vector<8x32xf32>
    %157 = arith.index_cast %c2_i32 : i32 to index
    %c0_56 = arith.constant 0 : index
    %c0_57 = arith.constant 0 : index
    %158 = vector.load %arg13[%157, %c0_56, %c0_57] : memref<8x8x32xf32, #tpu.memory_space<vmem>>, vector<1x8x32xf32>
    %159 = vector.shape_cast %158 : vector<1x8x32xf32> to vector<8x32xf32>
    %160 = arith.mulf %159, %156 : vector<8x32xf32>
    %cst_58 = arith.constant 1.000000e+00 : f32
    %161 = vector.broadcast %cst_58 : f32 to vector<8x32xf32>
    %162 = arith.subf %161, %159 : vector<8x32xf32>
    %163 = arith.mulf %162, %110 : vector<8x32xf32>
    %164 = arith.addf %160, %163 : vector<8x32xf32>
    %165 = arith.mulf %159, %154 : vector<8x32xf32>
    %cst_59 = arith.constant 1.000000e+00 : f32
    %166 = vector.broadcast %cst_59 : f32 to vector<8x32xf32>
    %167 = arith.subf %166, %159 : vector<8x32xf32>
    %168 = arith.mulf %167, %115 : vector<8x32xf32>
    %169 = arith.addf %165, %168 : vector<8x32xf32>
    %170 = vector.extract_strided_slice %164 {offsets = [0, 0], sizes = [8, 16], strides = [1, 1]} : vector<8x32xf32> to vector<8x16xf32>
    %171 = arith.index_cast %c2_i32 : i32 to index
    %c0_60 = arith.constant 0 : index
    %c0_61 = arith.constant 0 : index
    %172 = vector.load %arg11[%171, %c0_60, %c0_61] : memref<8x8x16xf32, #tpu.memory_space<vmem>>, vector<1x8x16xf32>
    %173 = vector.shape_cast %172 : vector<1x8x16xf32> to vector<8x16xf32>
    %174 = vector.shape_cast %170 : vector<8x16xf32> to vector<1x8x16xf32>
    tpu.vector_store %arg11[%171, %c0_60, %c0_61], %174 {strides = array<i32>} : memref<8x8x16xf32, #tpu.memory_space<vmem>>, vector<1x8x16xf32>,
    %175 = vector.extract_strided_slice %164 {offsets = [0, 16], sizes = [8, 16], strides = [1, 1]} : vector<8x32xf32> to vector<8x16xf32>
    %c7_i32_62 = arith.constant 7 : i32
    %176 = arith.subi %c7_i32_62, %c2_i32 : i32
    %177 = arith.index_cast %176 : i32 to index
    %c0_63 = arith.constant 0 : index
    %c0_64 = arith.constant 0 : index
    %178 = vector.load %arg12[%177, %c0_63, %c0_64] : memref<8x8x16xf32, #tpu.memory_space<vmem>>, vector<1x8x16xf32>
    %179 = vector.shape_cast %178 : vector<1x8x16xf32> to vector<8x16xf32>
    %180 = vector.shape_cast %175 : vector<8x16xf32> to vector<1x8x16xf32>
    tpu.vector_store %arg12[%177, %c0_63, %c0_64], %180 {strides = array<i32>} : memref<8x8x16xf32, #tpu.memory_space<vmem>>, vector<1x8x16xf32>,
    %c3_i32 = arith.constant 3 : i32
    %181 = arith.index_cast %c3_i32 : i32 to index
    %c0_65 = arith.constant 0 : index
    %c0_66 = arith.constant 0 : index
    %182 = vector.load %arg10[%181, %c0_65, %c0_66] : memref<8x8x128xf32, #tpu.memory_space<vmem>>, vector<1x8x128xf32>
    %183 = vector.shape_cast %182 : vector<1x8x128xf32> to vector<8x128xf32>
    %cst_67 = arith.constant dense<0.000000e+00> : vector<8x128xf32>
    %184 = tpu.matmul %164, %17, %cst_67 {dimension_numbers = #tpu.dot_dimension_numbers<[1], [0], [0], [1], [0, 0, 1, 1], [], []>} : vector<8x32xf32>, vector<32x128xf32>, vector<8x128xf32> -> vector<8x128xf32>
    %185 = arith.addf %183, %184 : vector<8x128xf32>
    %186 = vector.extract_strided_slice %185 {offsets = [0, 0], sizes = [8, 32], strides = [1, 1]} : vector<8x128xf32> to vector<8x32xf32>
    %187 = arith.negf %186 : vector<8x32xf32>
    %188 = math.exp %187 : vector<8x32xf32>
    %cst_68 = arith.constant 1.000000e+00 : f32
    %189 = vector.broadcast %cst_68 : f32 to vector<8x32xf32>
    %190 = arith.addf %189, %188 : vector<8x32xf32>
    %191 = arith.divf %189, %190 : vector<8x32xf32>
    %192 = vector.extract_strided_slice %185 {offsets = [0, 32], sizes = [8, 32], strides = [1, 1]} : vector<8x128xf32> to vector<8x32xf32>
    %193 = arith.negf %192 : vector<8x32xf32>
    %194 = math.exp %193 : vector<8x32xf32>
    %cst_69 = arith.constant 1.000000e+00 : f32
    %195 = vector.broadcast %cst_69 : f32 to vector<8x32xf32>
    %196 = arith.addf %195, %194 : vector<8x32xf32>
    %197 = arith.divf %195, %196 : vector<8x32xf32>
    %198 = vector.extract_strided_slice %185 {offsets = [0, 64], sizes = [8, 32], strides = [1, 1]} : vector<8x128xf32> to vector<8x32xf32>
    %199 = math.tanh %198 : vector<8x32xf32>
    %200 = vector.extract_strided_slice %185 {offsets = [0, 96], sizes = [8, 32], strides = [1, 1]} : vector<8x128xf32> to vector<8x32xf32>
    %201 = arith.negf %200 : vector<8x32xf32>
    %202 = math.exp %201 : vector<8x32xf32>
    %cst_70 = arith.constant 1.000000e+00 : f32
    %203 = vector.broadcast %cst_70 : f32 to vector<8x32xf32>
    %204 = arith.addf %203, %202 : vector<8x32xf32>
    %205 = arith.divf %203, %204 : vector<8x32xf32>
    %206 = arith.mulf %197, %169 : vector<8x32xf32>
    %207 = arith.mulf %191, %199 : vector<8x32xf32>
    %208 = arith.addf %206, %207 : vector<8x32xf32>
    %209 = math.tanh %208 : vector<8x32xf32>
    %210 = arith.mulf %205, %209 : vector<8x32xf32>
    %211 = arith.index_cast %c3_i32 : i32 to index
    %c0_71 = arith.constant 0 : index
    %c0_72 = arith.constant 0 : index
    %212 = vector.load %arg13[%211, %c0_71, %c0_72] : memref<8x8x32xf32, #tpu.memory_space<vmem>>, vector<1x8x32xf32>
    %213 = vector.shape_cast %212 : vector<1x8x32xf32> to vector<8x32xf32>
    %214 = arith.mulf %213, %210 : vector<8x32xf32>
    %cst_73 = arith.constant 1.000000e+00 : f32
    %215 = vector.broadcast %cst_73 : f32 to vector<8x32xf32>
    %216 = arith.subf %215, %213 : vector<8x32xf32>
    %217 = arith.mulf %216, %164 : vector<8x32xf32>
    %218 = arith.addf %214, %217 : vector<8x32xf32>
    %219 = arith.mulf %213, %208 : vector<8x32xf32>
    %cst_74 = arith.constant 1.000000e+00 : f32
    %220 = vector.broadcast %cst_74 : f32 to vector<8x32xf32>
    %221 = arith.subf %220, %213 : vector<8x32xf32>
    %222 = arith.mulf %221, %169 : vector<8x32xf32>
    %223 = arith.addf %219, %222 : vector<8x32xf32>
    %224 = vector.extract_strided_slice %218 {offsets = [0, 0], sizes = [8, 16], strides = [1, 1]} : vector<8x32xf32> to vector<8x16xf32>
    %225 = arith.index_cast %c3_i32 : i32 to index
    %c0_75 = arith.constant 0 : index
    %c0_76 = arith.constant 0 : index
    %226 = vector.load %arg11[%225, %c0_75, %c0_76] : memref<8x8x16xf32, #tpu.memory_space<vmem>>, vector<1x8x16xf32>
    %227 = vector.shape_cast %226 : vector<1x8x16xf32> to vector<8x16xf32>
    %228 = vector.shape_cast %224 : vector<8x16xf32> to vector<1x8x16xf32>
    tpu.vector_store %arg11[%225, %c0_75, %c0_76], %228 {strides = array<i32>} : memref<8x8x16xf32, #tpu.memory_space<vmem>>, vector<1x8x16xf32>,
    %229 = vector.extract_strided_slice %218 {offsets = [0, 16], sizes = [8, 16], strides = [1, 1]} : vector<8x32xf32> to vector<8x16xf32>
    %c7_i32_77 = arith.constant 7 : i32
    %230 = arith.subi %c7_i32_77, %c3_i32 : i32
    %231 = arith.index_cast %230 : i32 to index
    %c0_78 = arith.constant 0 : index
    %c0_79 = arith.constant 0 : index
    %232 = vector.load %arg12[%231, %c0_78, %c0_79] : memref<8x8x16xf32, #tpu.memory_space<vmem>>, vector<1x8x16xf32>
    %233 = vector.shape_cast %232 : vector<1x8x16xf32> to vector<8x16xf32>
    %234 = vector.shape_cast %229 : vector<8x16xf32> to vector<1x8x16xf32>
    tpu.vector_store %arg12[%231, %c0_78, %c0_79], %234 {strides = array<i32>} : memref<8x8x16xf32, #tpu.memory_space<vmem>>, vector<1x8x16xf32>,
    %c4_i32 = arith.constant 4 : i32
    %235 = arith.index_cast %c4_i32 : i32 to index
    %c0_80 = arith.constant 0 : index
    %c0_81 = arith.constant 0 : index
    %236 = vector.load %arg10[%235, %c0_80, %c0_81] : memref<8x8x128xf32, #tpu.memory_space<vmem>>, vector<1x8x128xf32>
    %237 = vector.shape_cast %236 : vector<1x8x128xf32> to vector<8x128xf32>
    %cst_82 = arith.constant dense<0.000000e+00> : vector<8x128xf32>
    %238 = tpu.matmul %218, %17, %cst_82 {dimension_numbers = #tpu.dot_dimension_numbers<[1], [0], [0], [1], [0, 0, 1, 1], [], []>} : vector<8x32xf32>, vector<32x128xf32>, vector<8x128xf32> -> vector<8x128xf32>
    %239 = arith.addf %237, %238 : vector<8x128xf32>
    %240 = vector.extract_strided_slice %239 {offsets = [0, 0], sizes = [8, 32], strides = [1, 1]} : vector<8x128xf32> to vector<8x32xf32>
    %241 = arith.negf %240 : vector<8x32xf32>
    %242 = math.exp %241 : vector<8x32xf32>
    %cst_83 = arith.constant 1.000000e+00 : f32
    %243 = vector.broadcast %cst_83 : f32 to vector<8x32xf32>
    %244 = arith.addf %243, %242 : vector<8x32xf32>
    %245 = arith.divf %243, %244 : vector<8x32xf32>
    %246 = vector.extract_strided_slice %239 {offsets = [0, 32], sizes = [8, 32], strides = [1, 1]} : vector<8x128xf32> to vector<8x32xf32>
    %247 = arith.negf %246 : vector<8x32xf32>
    %248 = math.exp %247 : vector<8x32xf32>
    %cst_84 = arith.constant 1.000000e+00 : f32
    %249 = vector.broadcast %cst_84 : f32 to vector<8x32xf32>
    %250 = arith.addf %249, %248 : vector<8x32xf32>
    %251 = arith.divf %249, %250 : vector<8x32xf32>
    %252 = vector.extract_strided_slice %239 {offsets = [0, 64], sizes = [8, 32], strides = [1, 1]} : vector<8x128xf32> to vector<8x32xf32>
    %253 = math.tanh %252 : vector<8x32xf32>
    %254 = vector.extract_strided_slice %239 {offsets = [0, 96], sizes = [8, 32], strides = [1, 1]} : vector<8x128xf32> to vector<8x32xf32>
    %255 = arith.negf %254 : vector<8x32xf32>
    %256 = math.exp %255 : vector<8x32xf32>
    %cst_85 = arith.constant 1.000000e+00 : f32
    %257 = vector.broadcast %cst_85 : f32 to vector<8x32xf32>
    %258 = arith.addf %257, %256 : vector<8x32xf32>
    %259 = arith.divf %257, %258 : vector<8x32xf32>
    %260 = arith.mulf %251, %223 : vector<8x32xf32>
    %261 = arith.mulf %245, %253 : vector<8x32xf32>
    %262 = arith.addf %260, %261 : vector<8x32xf32>
    %263 = math.tanh %262 : vector<8x32xf32>
    %264 = arith.mulf %259, %263 : vector<8x32xf32>
    %265 = arith.index_cast %c4_i32 : i32 to index
    %c0_86 = arith.constant 0 : index
    %c0_87 = arith.constant 0 : index
    %266 = vector.load %arg13[%265, %c0_86, %c0_87] : memref<8x8x32xf32, #tpu.memory_space<vmem>>, vector<1x8x32xf32>
    %267 = vector.shape_cast %266 : vector<1x8x32xf32> to vector<8x32xf32>
    %268 = arith.mulf %267, %264 : vector<8x32xf32>
    %cst_88 = arith.constant 1.000000e+00 : f32
    %269 = vector.broadcast %cst_88 : f32 to vector<8x32xf32>
    %270 = arith.subf %269, %267 : vector<8x32xf32>
    %271 = arith.mulf %270, %218 : vector<8x32xf32>
    %272 = arith.addf %268, %271 : vector<8x32xf32>
    %273 = arith.mulf %267, %262 : vector<8x32xf32>
    %cst_89 = arith.constant 1.000000e+00 : f32
    %274 = vector.broadcast %cst_89 : f32 to vector<8x32xf32>
    %275 = arith.subf %274, %267 : vector<8x32xf32>
    %276 = arith.mulf %275, %223 : vector<8x32xf32>
    %277 = arith.addf %273, %276 : vector<8x32xf32>
    %278 = vector.extract_strided_slice %272 {offsets = [0, 0], sizes = [8, 16], strides = [1, 1]} : vector<8x32xf32> to vector<8x16xf32>
    %279 = arith.index_cast %c4_i32 : i32 to index
    %c0_90 = arith.constant 0 : index
    %c0_91 = arith.constant 0 : index
    %280 = vector.load %arg11[%279, %c0_90, %c0_91] : memref<8x8x16xf32, #tpu.memory_space<vmem>>, vector<1x8x16xf32>
    %281 = vector.shape_cast %280 : vector<1x8x16xf32> to vector<8x16xf32>
    %282 = vector.shape_cast %278 : vector<8x16xf32> to vector<1x8x16xf32>
    tpu.vector_store %arg11[%279, %c0_90, %c0_91], %282 {strides = array<i32>} : memref<8x8x16xf32, #tpu.memory_space<vmem>>, vector<1x8x16xf32>,
    %283 = vector.extract_strided_slice %272 {offsets = [0, 16], sizes = [8, 16], strides = [1, 1]} : vector<8x32xf32> to vector<8x16xf32>
    %c7_i32_92 = arith.constant 7 : i32
    %284 = arith.subi %c7_i32_92, %c4_i32 : i32
    %285 = arith.index_cast %284 : i32 to index
    %c0_93 = arith.constant 0 : index
    %c0_94 = arith.constant 0 : index
    %286 = vector.load %arg12[%285, %c0_93, %c0_94] : memref<8x8x16xf32, #tpu.memory_space<vmem>>, vector<1x8x16xf32>
    %287 = vector.shape_cast %286 : vector<1x8x16xf32> to vector<8x16xf32>
    %288 = vector.shape_cast %283 : vector<8x16xf32> to vector<1x8x16xf32>
    tpu.vector_store %arg12[%285, %c0_93, %c0_94], %288 {strides = array<i32>} : memref<8x8x16xf32, #tpu.memory_space<vmem>>, vector<1x8x16xf32>,
    %c5_i32 = arith.constant 5 : i32
    %289 = arith.index_cast %c5_i32 : i32 to index
    %c0_95 = arith.constant 0 : index
    %c0_96 = arith.constant 0 : index
    %290 = vector.load %arg10[%289, %c0_95, %c0_96] : memref<8x8x128xf32, #tpu.memory_space<vmem>>, vector<1x8x128xf32>
    %291 = vector.shape_cast %290 : vector<1x8x128xf32> to vector<8x128xf32>
    %cst_97 = arith.constant dense<0.000000e+00> : vector<8x128xf32>
    %292 = tpu.matmul %272, %17, %cst_97 {dimension_numbers = #tpu.dot_dimension_numbers<[1], [0], [0], [1], [0, 0, 1, 1], [], []>} : vector<8x32xf32>, vector<32x128xf32>, vector<8x128xf32> -> vector<8x128xf32>
    %293 = arith.addf %291, %292 : vector<8x128xf32>
    %294 = vector.extract_strided_slice %293 {offsets = [0, 0], sizes = [8, 32], strides = [1, 1]} : vector<8x128xf32> to vector<8x32xf32>
    %295 = arith.negf %294 : vector<8x32xf32>
    %296 = math.exp %295 : vector<8x32xf32>
    %cst_98 = arith.constant 1.000000e+00 : f32
    %297 = vector.broadcast %cst_98 : f32 to vector<8x32xf32>
    %298 = arith.addf %297, %296 : vector<8x32xf32>
    %299 = arith.divf %297, %298 : vector<8x32xf32>
    %300 = vector.extract_strided_slice %293 {offsets = [0, 32], sizes = [8, 32], strides = [1, 1]} : vector<8x128xf32> to vector<8x32xf32>
    %301 = arith.negf %300 : vector<8x32xf32>
    %302 = math.exp %301 : vector<8x32xf32>
    %cst_99 = arith.constant 1.000000e+00 : f32
    %303 = vector.broadcast %cst_99 : f32 to vector<8x32xf32>
    %304 = arith.addf %303, %302 : vector<8x32xf32>
    %305 = arith.divf %303, %304 : vector<8x32xf32>
    %306 = vector.extract_strided_slice %293 {offsets = [0, 64], sizes = [8, 32], strides = [1, 1]} : vector<8x128xf32> to vector<8x32xf32>
    %307 = math.tanh %306 : vector<8x32xf32>
    %308 = vector.extract_strided_slice %293 {offsets = [0, 96], sizes = [8, 32], strides = [1, 1]} : vector<8x128xf32> to vector<8x32xf32>
    %309 = arith.negf %308 : vector<8x32xf32>
    %310 = math.exp %309 : vector<8x32xf32>
    %cst_100 = arith.constant 1.000000e+00 : f32
    %311 = vector.broadcast %cst_100 : f32 to vector<8x32xf32>
    %312 = arith.addf %311, %310 : vector<8x32xf32>
    %313 = arith.divf %311, %312 : vector<8x32xf32>
    %314 = arith.mulf %305, %277 : vector<8x32xf32>
    %315 = arith.mulf %299, %307 : vector<8x32xf32>
    %316 = arith.addf %314, %315 : vector<8x32xf32>
    %317 = math.tanh %316 : vector<8x32xf32>
    %318 = arith.mulf %313, %317 : vector<8x32xf32>
    %319 = arith.index_cast %c5_i32 : i32 to index
    %c0_101 = arith.constant 0 : index
    %c0_102 = arith.constant 0 : index
    %320 = vector.load %arg13[%319, %c0_101, %c0_102] : memref<8x8x32xf32, #tpu.memory_space<vmem>>, vector<1x8x32xf32>
    %321 = vector.shape_cast %320 : vector<1x8x32xf32> to vector<8x32xf32>
    %322 = arith.mulf %321, %318 : vector<8x32xf32>
    %cst_103 = arith.constant 1.000000e+00 : f32
    %323 = vector.broadcast %cst_103 : f32 to vector<8x32xf32>
    %324 = arith.subf %323, %321 : vector<8x32xf32>
    %325 = arith.mulf %324, %272 : vector<8x32xf32>
    %326 = arith.addf %322, %325 : vector<8x32xf32>
    %327 = arith.mulf %321, %316 : vector<8x32xf32>
    %cst_104 = arith.constant 1.000000e+00 : f32
    %328 = vector.broadcast %cst_104 : f32 to vector<8x32xf32>
    %329 = arith.subf %328, %321 : vector<8x32xf32>
    %330 = arith.mulf %329, %277 : vector<8x32xf32>
    %331 = arith.addf %327, %330 : vector<8x32xf32>
    %332 = vector.extract_strided_slice %326 {offsets = [0, 0], sizes = [8, 16], strides = [1, 1]} : vector<8x32xf32> to vector<8x16xf32>
    %333 = arith.index_cast %c5_i32 : i32 to index
    %c0_105 = arith.constant 0 : index
    %c0_106 = arith.constant 0 : index
    %334 = vector.load %arg11[%333, %c0_105, %c0_106] : memref<8x8x16xf32, #tpu.memory_space<vmem>>, vector<1x8x16xf32>
    %335 = vector.shape_cast %334 : vector<1x8x16xf32> to vector<8x16xf32>
    %336 = vector.shape_cast %332 : vector<8x16xf32> to vector<1x8x16xf32>
    tpu.vector_store %arg11[%333, %c0_105, %c0_106], %336 {strides = array<i32>} : memref<8x8x16xf32, #tpu.memory_space<vmem>>, vector<1x8x16xf32>,
    %337 = vector.extract_strided_slice %326 {offsets = [0, 16], sizes = [8, 16], strides = [1, 1]} : vector<8x32xf32> to vector<8x16xf32>
    %c7_i32_107 = arith.constant 7 : i32
    %338 = arith.subi %c7_i32_107, %c5_i32 : i32
    %339 = arith.index_cast %338 : i32 to index
    %c0_108 = arith.constant 0 : index
    %c0_109 = arith.constant 0 : index
    %340 = vector.load %arg12[%339, %c0_108, %c0_109] : memref<8x8x16xf32, #tpu.memory_space<vmem>>, vector<1x8x16xf32>
    %341 = vector.shape_cast %340 : vector<1x8x16xf32> to vector<8x16xf32>
    %342 = vector.shape_cast %337 : vector<8x16xf32> to vector<1x8x16xf32>
    tpu.vector_store %arg12[%339, %c0_108, %c0_109], %342 {strides = array<i32>} : memref<8x8x16xf32, #tpu.memory_space<vmem>>, vector<1x8x16xf32>,
    %c6_i32 = arith.constant 6 : i32
    %343 = arith.index_cast %c6_i32 : i32 to index
    %c0_110 = arith.constant 0 : index
    %c0_111 = arith.constant 0 : index
    %344 = vector.load %arg10[%343, %c0_110, %c0_111] : memref<8x8x128xf32, #tpu.memory_space<vmem>>, vector<1x8x128xf32>
    %345 = vector.shape_cast %344 : vector<1x8x128xf32> to vector<8x128xf32>
    %cst_112 = arith.constant dense<0.000000e+00> : vector<8x128xf32>
    %346 = tpu.matmul %326, %17, %cst_112 {dimension_numbers = #tpu.dot_dimension_numbers<[1], [0], [0], [1], [0, 0, 1, 1], [], []>} : vector<8x32xf32>, vector<32x128xf32>, vector<8x128xf32> -> vector<8x128xf32>
    %347 = arith.addf %345, %346 : vector<8x128xf32>
    %348 = vector.extract_strided_slice %347 {offsets = [0, 0], sizes = [8, 32], strides = [1, 1]} : vector<8x128xf32> to vector<8x32xf32>
    %349 = arith.negf %348 : vector<8x32xf32>
    %350 = math.exp %349 : vector<8x32xf32>
    %cst_113 = arith.constant 1.000000e+00 : f32
    %351 = vector.broadcast %cst_113 : f32 to vector<8x32xf32>
    %352 = arith.addf %351, %350 : vector<8x32xf32>
    %353 = arith.divf %351, %352 : vector<8x32xf32>
    %354 = vector.extract_strided_slice %347 {offsets = [0, 32], sizes = [8, 32], strides = [1, 1]} : vector<8x128xf32> to vector<8x32xf32>
    %355 = arith.negf %354 : vector<8x32xf32>
    %356 = math.exp %355 : vector<8x32xf32>
    %cst_114 = arith.constant 1.000000e+00 : f32
    %357 = vector.broadcast %cst_114 : f32 to vector<8x32xf32>
    %358 = arith.addf %357, %356 : vector<8x32xf32>
    %359 = arith.divf %357, %358 : vector<8x32xf32>
    %360 = vector.extract_strided_slice %347 {offsets = [0, 64], sizes = [8, 32], strides = [1, 1]} : vector<8x128xf32> to vector<8x32xf32>
    %361 = math.tanh %360 : vector<8x32xf32>
    %362 = vector.extract_strided_slice %347 {offsets = [0, 96], sizes = [8, 32], strides = [1, 1]} : vector<8x128xf32> to vector<8x32xf32>
    %363 = arith.negf %362 : vector<8x32xf32>
    %364 = math.exp %363 : vector<8x32xf32>
    %cst_115 = arith.constant 1.000000e+00 : f32
    %365 = vector.broadcast %cst_115 : f32 to vector<8x32xf32>
    %366 = arith.addf %365, %364 : vector<8x32xf32>
    %367 = arith.divf %365, %366 : vector<8x32xf32>
    %368 = arith.mulf %359, %331 : vector<8x32xf32>
    %369 = arith.mulf %353, %361 : vector<8x32xf32>
    %370 = arith.addf %368, %369 : vector<8x32xf32>
    %371 = math.tanh %370 : vector<8x32xf32>
    %372 = arith.mulf %367, %371 : vector<8x32xf32>
    %373 = arith.index_cast %c6_i32 : i32 to index
    %c0_116 = arith.constant 0 : index
    %c0_117 = arith.constant 0 : index
    %374 = vector.load %arg13[%373, %c0_116, %c0_117] : memref<8x8x32xf32, #tpu.memory_space<vmem>>, vector<1x8x32xf32>
    %375 = vector.shape_cast %374 : vector<1x8x32xf32> to vector<8x32xf32>
    %376 = arith.mulf %375, %372 : vector<8x32xf32>
    %cst_118 = arith.constant 1.000000e+00 : f32
    %377 = vector.broadcast %cst_118 : f32 to vector<8x32xf32>
    %378 = arith.subf %377, %375 : vector<8x32xf32>
    %379 = arith.mulf %378, %326 : vector<8x32xf32>
    %380 = arith.addf %376, %379 : vector<8x32xf32>
    %381 = arith.mulf %375, %370 : vector<8x32xf32>
    %cst_119 = arith.constant 1.000000e+00 : f32
    %382 = vector.broadcast %cst_119 : f32 to vector<8x32xf32>
    %383 = arith.subf %382, %375 : vector<8x32xf32>
    %384 = arith.mulf %383, %331 : vector<8x32xf32>
    %385 = arith.addf %381, %384 : vector<8x32xf32>
    %386 = vector.extract_strided_slice %380 {offsets = [0, 0], sizes = [8, 16], strides = [1, 1]} : vector<8x32xf32> to vector<8x16xf32>
    %387 = arith.index_cast %c6_i32 : i32 to index
    %c0_120 = arith.constant 0 : index
    %c0_121 = arith.constant 0 : index
    %388 = vector.load %arg11[%387, %c0_120, %c0_121] : memref<8x8x16xf32, #tpu.memory_space<vmem>>, vector<1x8x16xf32>
    %389 = vector.shape_cast %388 : vector<1x8x16xf32> to vector<8x16xf32>
    %390 = vector.shape_cast %386 : vector<8x16xf32> to vector<1x8x16xf32>
    tpu.vector_store %arg11[%387, %c0_120, %c0_121], %390 {strides = array<i32>} : memref<8x8x16xf32, #tpu.memory_space<vmem>>, vector<1x8x16xf32>,
    %391 = vector.extract_strided_slice %380 {offsets = [0, 16], sizes = [8, 16], strides = [1, 1]} : vector<8x32xf32> to vector<8x16xf32>
    %c7_i32_122 = arith.constant 7 : i32
    %392 = arith.subi %c7_i32_122, %c6_i32 : i32
    %393 = arith.index_cast %392 : i32 to index
    %c0_123 = arith.constant 0 : index
    %c0_124 = arith.constant 0 : index
    %394 = vector.load %arg12[%393, %c0_123, %c0_124] : memref<8x8x16xf32, #tpu.memory_space<vmem>>, vector<1x8x16xf32>
    %395 = vector.shape_cast %394 : vector<1x8x16xf32> to vector<8x16xf32>
    %396 = vector.shape_cast %391 : vector<8x16xf32> to vector<1x8x16xf32>
    tpu.vector_store %arg12[%393, %c0_123, %c0_124], %396 {strides = array<i32>} : memref<8x8x16xf32, #tpu.memory_space<vmem>>, vector<1x8x16xf32>,
    %c7_i32_125 = arith.constant 7 : i32
    %397 = arith.index_cast %c7_i32_125 : i32 to index
    %c0_126 = arith.constant 0 : index
    %c0_127 = arith.constant 0 : index
    %398 = vector.load %arg10[%397, %c0_126, %c0_127] : memref<8x8x128xf32, #tpu.memory_space<vmem>>, vector<1x8x128xf32>
    %399 = vector.shape_cast %398 : vector<1x8x128xf32> to vector<8x128xf32>
    %cst_128 = arith.constant dense<0.000000e+00> : vector<8x128xf32>
    %400 = tpu.matmul %380, %17, %cst_128 {dimension_numbers = #tpu.dot_dimension_numbers<[1], [0], [0], [1], [0, 0, 1, 1], [], []>} : vector<8x32xf32>, vector<32x128xf32>, vector<8x128xf32> -> vector<8x128xf32>
    %401 = arith.addf %399, %400 : vector<8x128xf32>
    %402 = vector.extract_strided_slice %401 {offsets = [0, 0], sizes = [8, 32], strides = [1, 1]} : vector<8x128xf32> to vector<8x32xf32>
    %403 = arith.negf %402 : vector<8x32xf32>
    %404 = math.exp %403 : vector<8x32xf32>
    %cst_129 = arith.constant 1.000000e+00 : f32
    %405 = vector.broadcast %cst_129 : f32 to vector<8x32xf32>
    %406 = arith.addf %405, %404 : vector<8x32xf32>
    %407 = arith.divf %405, %406 : vector<8x32xf32>
    %408 = vector.extract_strided_slice %401 {offsets = [0, 32], sizes = [8, 32], strides = [1, 1]} : vector<8x128xf32> to vector<8x32xf32>
    %409 = arith.negf %408 : vector<8x32xf32>
    %410 = math.exp %409 : vector<8x32xf32>
    %cst_130 = arith.constant 1.000000e+00 : f32
    %411 = vector.broadcast %cst_130 : f32 to vector<8x32xf32>
    %412 = arith.addf %411, %410 : vector<8x32xf32>
    %413 = arith.divf %411, %412 : vector<8x32xf32>
    %414 = vector.extract_strided_slice %401 {offsets = [0, 64], sizes = [8, 32], strides = [1, 1]} : vector<8x128xf32> to vector<8x32xf32>
    %415 = math.tanh %414 : vector<8x32xf32>
    %416 = vector.extract_strided_slice %401 {offsets = [0, 96], sizes = [8, 32], strides = [1, 1]} : vector<8x128xf32> to vector<8x32xf32>
    %417 = arith.negf %416 : vector<8x32xf32>
    %418 = math.exp %417 : vector<8x32xf32>
    %cst_131 = arith.constant 1.000000e+00 : f32
    %419 = vector.broadcast %cst_131 : f32 to vector<8x32xf32>
    %420 = arith.addf %419, %418 : vector<8x32xf32>
    %421 = arith.divf %419, %420 : vector<8x32xf32>
    %422 = arith.mulf %413, %385 : vector<8x32xf32>
    %423 = arith.mulf %407, %415 : vector<8x32xf32>
    %424 = arith.addf %422, %423 : vector<8x32xf32>
    %425 = math.tanh %424 : vector<8x32xf32>
    %426 = arith.mulf %421, %425 : vector<8x32xf32>
    %427 = arith.index_cast %c7_i32_125 : i32 to index
    %c0_132 = arith.constant 0 : index
    %c0_133 = arith.constant 0 : index
    %428 = vector.load %arg13[%427, %c0_132, %c0_133] : memref<8x8x32xf32, #tpu.memory_space<vmem>>, vector<1x8x32xf32>
    %429 = vector.shape_cast %428 : vector<1x8x32xf32> to vector<8x32xf32>
    %430 = arith.mulf %429, %426 : vector<8x32xf32>
    %cst_134 = arith.constant 1.000000e+00 : f32
    %431 = vector.broadcast %cst_134 : f32 to vector<8x32xf32>
    %432 = arith.subf %431, %429 : vector<8x32xf32>
    %433 = arith.mulf %432, %380 : vector<8x32xf32>
    %434 = arith.addf %430, %433 : vector<8x32xf32>
    %435 = arith.mulf %429, %424 : vector<8x32xf32>
    %cst_135 = arith.constant 1.000000e+00 : f32
    %436 = vector.broadcast %cst_135 : f32 to vector<8x32xf32>
    %437 = arith.subf %436, %429 : vector<8x32xf32>
    %438 = arith.mulf %437, %385 : vector<8x32xf32>
    %439 = arith.addf %435, %438 : vector<8x32xf32>
    %440 = vector.extract_strided_slice %434 {offsets = [0, 0], sizes = [8, 16], strides = [1, 1]} : vector<8x32xf32> to vector<8x16xf32>
    %441 = arith.index_cast %c7_i32_125 : i32 to index
    %c0_136 = arith.constant 0 : index
    %c0_137 = arith.constant 0 : index
    %442 = vector.load %arg11[%441, %c0_136, %c0_137] : memref<8x8x16xf32, #tpu.memory_space<vmem>>, vector<1x8x16xf32>
    %443 = vector.shape_cast %442 : vector<1x8x16xf32> to vector<8x16xf32>
    %444 = vector.shape_cast %440 : vector<8x16xf32> to vector<1x8x16xf32>
    tpu.vector_store %arg11[%441, %c0_136, %c0_137], %444 {strides = array<i32>} : memref<8x8x16xf32, #tpu.memory_space<vmem>>, vector<1x8x16xf32>,
    %445 = vector.extract_strided_slice %434 {offsets = [0, 16], sizes = [8, 16], strides = [1, 1]} : vector<8x32xf32> to vector<8x16xf32>
    %c7_i32_138 = arith.constant 7 : i32
    %446 = arith.subi %c7_i32_138, %c7_i32_125 : i32
    %447 = arith.index_cast %446 : i32 to index
    %c0_139 = arith.constant 0 : index
    %c0_140 = arith.constant 0 : index
    %448 = vector.load %arg12[%447, %c0_139, %c0_140] : memref<8x8x16xf32, #tpu.memory_space<vmem>>, vector<1x8x16xf32>
    %449 = vector.shape_cast %448 : vector<1x8x16xf32> to vector<8x16xf32>
    %450 = vector.shape_cast %445 : vector<8x16xf32> to vector<1x8x16xf32>
    tpu.vector_store %arg12[%447, %c0_139, %c0_140], %450 {strides = array<i32>} : memref<8x8x16xf32, #tpu.memory_space<vmem>>, vector<1x8x16xf32>,
    %c8_i32 = arith.constant 8 : i32
    %c0_141 = arith.constant 0 : index
    %c0_142 = arith.constant 0 : index
    %c0_143 = arith.constant 0 : index
    %451 = vector.load %arg11[%c0_141, %c0_142, %c0_143] : memref<8x8x16xf32, #tpu.memory_space<vmem>>, vector<8x8x16xf32>
    %c0_144 = arith.constant 0 : index
    %c0_145 = arith.constant 0 : index
    %c0_146 = arith.constant 0 : index
    %452 = vector.load %arg12[%c0_144, %c0_145, %c0_146] : memref<8x8x16xf32, #tpu.memory_space<vmem>>, vector<8x8x16xf32>
    %453 = tpu.concatenate %451, %452 in 2 : vector<8x8x16xf32>, vector<8x8x16xf32> -> vector<8x8x32xf32>
    %454 = vector.shape_cast %453 : vector<8x8x32xf32> to vector<64x32xf32>
    %c0_147 = arith.constant 0 : index
    %c0_148 = arith.constant 0 : index
    %455 = vector.load %arg7[%c0_147, %c0_148] : memref<32x128xf32, #tpu.memory_space<vmem>>, vector<32x128xf32>
    %cst_149 = arith.constant dense<0.000000e+00> : vector<64x128xf32>
    %456 = tpu.matmul %454, %455, %cst_149 {dimension_numbers = #tpu.dot_dimension_numbers<[1], [0], [0], [1], [0, 0, 1, 1], [], []>} : vector<64x32xf32>, vector<32x128xf32>, vector<64x128xf32> -> vector<64x128xf32>
    %c0_150 = arith.constant 0 : index
    %c0_151 = arith.constant 0 : index
    %457 = vector.load %arg8[%c0_150, %c0_151] : memref<1x128xf32, #tpu.memory_space<vmem>>, vector<1x128xf32>
    %458 = vector.broadcast %457 : vector<1x128xf32> to vector<64x128xf32>
    %459 = arith.addf %456, %458 : vector<64x128xf32>
    %c0_152 = arith.constant 0 : index
    %c0_153 = arith.constant 0 : index
    %c0_154 = arith.constant 0 : index
    %460 = vector.load %arg2[%c0_152, %c0_153, %c0_154] : memref<8x8x1xf32, #tpu.memory_space<vmem>>, vector<8x8x1xf32>
    %461 = vector.shape_cast %460 : vector<8x8x1xf32> to vector<64x1xf32>
    %462 = vector.broadcast %461 : vector<64x1xf32> to vector<64x128xf32>
    %463 = arith.mulf %459, %462 : vector<64x128xf32>
    %464 = vector.shape_cast %463 : vector<64x128xf32> to vector<8x8x128xf32>
    %c0_155 = arith.constant 0 : index
    %c0_156 = arith.constant 0 : index
    %c0_157 = arith.constant 0 : index
    %465 = vector.load %arg9[%c0_155, %c0_156, %c0_157] : memref<8x8x128xf32, #tpu.memory_space<vmem>>, vector<8x8x128xf32>
    tpu.vector_store %arg9[%c0_155, %c0_156, %c0_157], %464 {strides = array<i32>} : memref<8x8x128xf32, #tpu.memory_space<vmem>>, vector<8x8x128xf32>,
    return
  }
  func.func @transform_0(%arg0: i32) -> (i32, i32, i32) {
    %c0_i32 = arith.constant 0 : i32
    %c0_i32_0 = arith.constant 0 : i32
    %c0_i32_1 = arith.constant 0 : i32
    return %c0_i32, %arg0, %c0_i32_0 : i32, i32, i32
  }
  func.func @transform_1(%arg0: i32) -> (i32, i32, i32) {
    %c0_i32 = arith.constant 0 : i32
    %c0_i32_0 = arith.constant 0 : i32
    %c0_i32_1 = arith.constant 0 : i32
    return %c0_i32, %arg0, %c0_i32_0 : i32, i32, i32
  }
  func.func @transform_2(%arg0: i32) -> (i32, i32, i32) {
    %c0_i32 = arith.constant 0 : i32
    %c0_i32_0 = arith.constant 0 : i32
    %c0_i32_1 = arith.constant 0 : i32
    return %c0_i32, %arg0, %c0_i32_0 : i32, i32, i32
  }
  func.func @transform_3(%arg0: i32) -> (i32, i32) {
    %c0_i32 = arith.constant 0 : i32
    %c0_i32_0 = arith.constant 0 : i32
    %c0_i32_1 = arith.constant 0 : i32
    return %c0_i32, %c0_i32_0 : i32, i32
  }
  func.func @transform_4(%arg0: i32) -> (i32, i32) {
    %c0_i32 = arith.constant 0 : i32
    %c0_i32_0 = arith.constant 0 : i32
    %c0_i32_1 = arith.constant 0 : i32
    return %c0_i32, %c0_i32_0 : i32, i32
  }
  func.func @transform_5(%arg0: i32) -> (i32, i32) {
    %c0_i32 = arith.constant 0 : i32
    %c0_i32_0 = arith.constant 0 : i32
    %c0_i32_1 = arith.constant 0 : i32
    return %c0_i32, %c0_i32_0 : i32, i32
  }
  func.func @transform_6(%arg0: i32) -> (i32, i32) {
    %c0_i32 = arith.constant 0 : i32
    %c0_i32_0 = arith.constant 0 : i32
    %c0_i32_1 = arith.constant 0 : i32
    return %c0_i32, %c0_i32_0 : i32, i32
  }
  func.func @transform_7(%arg0: i32) -> (i32, i32) {
    %c0_i32 = arith.constant 0 : i32
    %c0_i32_0 = arith.constant 0 : i32
    %c0_i32_1 = arith.constant 0 : i32
    return %c0_i32, %c0_i32_0 : i32, i32
  }
  func.func @transform_8(%arg0: i32) -> (i32, i32, i32) {
    %c0_i32 = arith.constant 0 : i32
    %c0_i32_0 = arith.constant 0 : i32
    %c0_i32_1 = arith.constant 0 : i32
    return %c0_i32, %arg0, %c0_i32_0 : i32, i32, i32
  }
}

</mosaic_0001>

<bundles_post_ra>
// kernel: tpu_custom_call.1
= control target key start
LH: loop header
LB: loop body
LE: loop exit
PB: predicated region body
PF: predicated region fallthrough
CT: control target
= control target key end

     0   :  { %13 = vsyncpa [#allocation7], 0  ;;  %s2510_s0 = inlined_call_operand.vmem [shape: f32[8,8,64], index: 0, kind: input, shape index: {}]   ;;  %s2511_s1 = inlined_call_operand.vmem [shape: f32[8,8,1], index: 1, kind: input, shape index: {}]   ;;  %s2512_s2 = inlined_call_operand.vmem [shape: f32[8,8,1], index: 2, kind: input, shape index: {}]   ;;  %s2513_s3 = inlined_call_operand.vmem [shape: f32[64,128], index: 3, kind: input, shape index: {}]   ;;  %s2514_s4 = inlined_call_operand.hbm [shape: f32[32,128], index: 4, kind: input, shape index: {}]   ;;  %s2515_s5 = inlined_call_operand.vmem [shape: f32[1,128], index: 5, kind: input, shape index: {}]   ;;  %s2516_s6 = inlined_call_operand.vmem [shape: f32[32,128], index: 6, kind: input, shape index: {}]   ;;  %s2517_s7 = inlined_call_operand.vmem [shape: f32[1,128], index: 7, kind: input, shape index: {}]   ;;  %s2518_s8 = inlined_call_operand.hbm [shape: f32[8,8,128], index: 8, kind: output, shape index: {}]  }
   0x1   :  { %14 = vsyncpa [#allocation8], 0  ;;  %s2045_s27 = smov [#allocation6]   ;;  %s1997_s9 = scalar_lea.hbm %s2514_s4, 512 }
   0x2   :  { %s28_s28 = sshll.u32 %s2045_s27, 4  ;;  %p1998_p0 = scmp.ne.s32.totalorder %s2514_s4, %s1997_s9  ;;  %s29_s28 = int_to_ptr.vmem [resolvable:$true] %s28_s28 }
   0x3   :  { %p2001_p1 = scmp.lt.u32.totalorder %s1997_s9, %s2514_s4 }
   0x5   :  { %p2003_p2 = pnand %p2001_p1, %p1998_p0 }
   0x7   :  { %2006 = shalt.err (!%p2003_p2)
}
   0x8   :  { %s2007_s14 = scalar_lea.vmem %s29_s28, 512  ;;  %p2012_p4 = scmp.lt.s32.totalorder %s29_s28, %s29_s28 }
   0x9   :  { %p2008_p3 = scmp.ne.s32.totalorder %s29_s28, %s2007_s14  ;;  %p2013_p5 = scmp.lt.s32.totalorder %s2007_s14, %s2007_s14 }
   0xb   :  { %p2014_p6 = por %p2013_p5, %p2012_p4 }
   0xd   :  { %p2015_p7 = pnand %p2014_p6, %p2008_p3 }
   0xf   :  { %2018 = shalt.err (!%p2015_p7)
}
  0x10   :  { %s2046_s15 = smov 128   ;;  %s2047_s16 = smov 8  }
  0x11   :  { %34 = dma.hbm_to_vmem [thread:$0]  %s2514_s4, 512, %s29_s28, [#allocation7], %s2046_s15, %s2046_s15, %s2047_s16  }
  0x12   :  { %2041 = dma.done.wait [#allocation7], 512  }
  0x13   :  { %2042 = vsyncadd [#allocation7], 4294966784  ;;  %v2048_v0 = vmov 0.0|0.0   ;;  %vm2049_vm0 = vmmov 0   ;;  %v2050_v1 = vmov 0.0   ;;  %v52_v2 = vld [vmem:[%s2513_s3] sm:$0xff] }
  0x14   :  { %1868 = vmatprep.subr.bf16.mxu1 %v2048_v0  ;;  %1757 = vmatprep.mubr.msk.f32.mxu1 %vm2049_vm0, %v2050_v1  ;;  %v53_v3 = vld [vmem:[%s2513_s3 + $0x8] sm:$0xff]  ;;  %v54_v4 = vld [vmem:[%s2513_s3 + $0x10] sm:$0xff]  ;;  %vm67_vm1 = vcmask 523264   ;;  %v55_v6 = vld [vmem:[%s2513_s3 + $0x18] sm:$0xff]  ;;  %s2052_s29 = smov 32   ;;  %v2053_v55 = vmov 0  }
  0x15   :  { %v1846_v5 = vpack.c.bf16 %v53_v3, %v52_v2  ;;  %v1850_v7 = vpack.c.bf16 %v55_v6, %v54_v4  ;;  %v56_v8 = vld [vmem:[%s2513_s3 + $0x20] sm:$0xff]  ;;  %v57_v9 = vld [vmem:[%s2513_s3 + $0x28] sm:$0xff]  ;;  %v321_v15 = vld [vmem:[#allocation6 + $0x10] sm:$0xff]  ;;  %1932 = vset.pattern.permute.xlu0 %v2053_v55  ;;  %1931 = vset.pattern.permute.xlu1 %v2053_v55  ;;  %s2054_s12 = smov 96   ;;  %vm301_vm2 = vcmask 130048   ;;  %vm310_vm3 = vcmask 261120  }
  0x16   :  { %v44_v10 = vld [vmem:[%s2510_s0] sm:$0xff]  ;;  %v320_v12 = vld [vmem:[#allocation6 + $0x8] sm:$0xff]  ;;  %v1854_v14 = vpack.c.bf16 %v57_v9, %v56_v8  ;;  %v322_v16 = vld [vmem:[#allocation6 + $0x18] sm:$0xff]  ;;  %s2055_s20 = smov 112  }
  0x17   :  { %1847 = vmatprep.subr.bf16.mxu0 %v1846_v5  ;;  %1726 = vmatprep.mubr.msk.f32.mxu0 %vm67_vm1, %v44_v10  ;;  %v319_v11 = vld [vmem:[#allocation6] sm:$0xff]  ;;  %v58_v17 = vld [vmem:[%s2513_s3 + $0x30] sm:$0xff]  ;;  %v59_v18 = vld [vmem:[%s2513_s3 + $0x38] sm:$0xff]  ;;  %v2153_v19 = vpack.c.bf16 %v322_v16, %v321_v15 }
  0x18   :  { %1849 = vmatpush3.bf16.msra.mxu0 %v1846_v5  ;;  %v2143_v13 = vpack.c.bf16 %v320_v12, %v319_v11  ;;  %v1858_v20 = vpack.c.bf16 %v59_v18, %v58_v17  ;;  %v45_v21 = vld [vmem:[%s2510_s0 + $0x8] sm:$0xff]  ;;  %v46_v22 = vld [vmem:[%s2510_s0 + $0x10] sm:$0xff]  ;;  %v47_v23 = vld [vmem:[%s2510_s0 + $0x18] sm:$0xff] }
  0x19   :  { %1851 = vmatprep.subr.bf16.mxu0 %v1850_v7  ;;  %v48_v24 = vld [vmem:[%s2510_s0 + $0x20] sm:$0xff]  ;;  %v49_v25 = vld [vmem:[%s2510_s0 + $0x28] sm:$0xff]  ;;  %v50_v26 = vld [vmem:[%s2510_s0 + $0x30] sm:$0xff] }
  0x1a   :  { %1870 = vmatpush3.bf16.msra.mxu1 %v2143_v13  ;;  %v51_v27 = vld [vmem:[%s2510_s0 + $0x38] sm:$0xff]  ;;  %v1609_v28 = vld [vmem:[%s2515_s5] ss:$0 sm:$0xff]  ;;  %s2051_s5 = smov 64  }
  0x1b   :  { %1871 = vmatprep.subr.bf16.mxu1 %v2048_v0  ;;  %v253_v56 = vld [vmem:[%s2512_s2] sm:$0xff] }
  0x1c   :  { %1853 = vmatpush3.bf16.msra.mxu0 %v1850_v7  ;;  %v2225_v61 = vld [vmem:[%s2511_s1] sm:$0xff] }
  0x1d   :  { %1855 = vmatprep.subr.bf16.mxu0 %v1854_v14 }
  0x1e   :  { %1873 = vmatpush3.bf16.msra.mxu1 %v2153_v19 }
  0x1f   :  { %1874 = vmatprep.subr.bf16.mxu1 %v2048_v0 }
  0x20   :  { %1857 = vmatpush3.bf16.msra.mxu0 %v1854_v14 }
  0x21   :  { %1859 = vmatprep.subr.bf16.mxu0 %v1858_v20 }
  0x24   :  { %1861 = vmatpush3.bf16.msra.mxu0 %v1858_v20 }
  0x25   :  { %1862 = vmatprep.subr.bf16.mxu0 %v2048_v0 }
  0x27   :  { %1727 = vmatmul.mubr.msk.f32.vlgmr.msra.gmra.mrb[0].mxu0 %vm67_vm1, %v45_v21 }
  0x28   :  { %1864 = vmatpush3.bf16.msra.mxu0 %v2143_v13  ;;  %1729 = vmatprep.mubr.msk.f32.mxu0 %vm67_vm1, %v46_v22 }
  0x29   :  { %1865 = vmatprep.subr.bf16.mxu0 %v2048_v0 }
  0x2b   :  { %1730 = vmatmul.mubr.msk.f32.gmra.mrb[2].mxu0 %vm67_vm1, %v47_v23 }
  0x2c   :  { %1732 = vmatprep.mubr.msk.f32.mxu0 %vm67_vm1, %v48_v24  ;;  %1867 = vmatpush3.bf16.msra.mxu0 %v2153_v19 }
  0x2d   :  { %1880 = vmatprep.subr.bf16.mxu0 %v2048_v0 }
  0x2f   :  { %1733 = vmatmul.mubr.msk.f32.gmra.mrb[4].mxu0 %vm67_vm1, %v49_v25 }
  0x30   :  { %1735 = vmatprep.mubr.msk.f32.mxu0 %vm67_vm1, %v50_v26  ;;  %v2251_v26 = vld [vmem:[%s2511_s1 + $0x8] sm:$0xff] }
  0x33   :  { %1736 = vmatmul.mubr.msk.f32.gmra.mrb[6].mxu0 %vm67_vm1, %v51_v27 }
  0x34   :  { %1746 = vmatprep.mubr.msk.f32.mxu0 %vm2049_vm0, %v2050_v1 }
  0x37   :  { %1747 = vmatmul.mubr.f32.vlgmr.msra.gmra.mrb[8].mxu0 %v2050_v1 }
  0x38   :  { %1882 = vmatpush3.bf16.msra.mxu0 %v2143_v13  ;;  %1779 = vmatprep.mubr.msk.f32.mxu0 %vm2049_vm0, %v2050_v1 }
  0x39   :  { %1883 = vmatprep.subr.bf16.mxu0 %v2048_v0 }
  0x3c   :  { %1885 = vmatpush3.bf16.msra.mxu0 %v2153_v19 }
  0x3d   :  { %1892 = vmatprep.subr.bf16.mxu0 %v2048_v0 }
  0xfa   :  { %v1728_v29 = vpop.f32.mrb[0].mxu0 }
  0xfb   :  { %v2202_v30 = vadd.f32 %v1728_v29, %v1609_v28  ;;  %v158_v31 = vpop.f32.mrb[1].mxu0 }
  0xfc   :  { %v159_v44 = vadd.f32 %v1609_v28, %v158_v31 }
  0xfe   :  { %v1731_v32 = vpop.f32.mrb[2].mxu0 }
  0xff   :  { %v2204_v33 = vadd.f32 %v1731_v32, %v1609_v28  ;;  %v168_v34 = vpop.f32.mrb[3].mxu0  ;;  %v254_v32 = vld [vmem:[%s2512_s2 + $0x8] sm:$0xff] }
 0x100   :  { %v2206_v35 = vadd.f32 %v1609_v28, %v168_v34 }
 0x102   :  { %v1734_v36 = vpop.f32.mrb[4].mxu0 }
 0x103   :  { %v2208_v37 = vadd.f32 %v1734_v36, %v1609_v28  ;;  %v178_v38 = vpop.f32.mrb[5].mxu0 }
 0x104   :  { %v2210_v39 = vadd.f32 %v1609_v28, %v178_v38 }
 0x106   :  { %v1737_v40 = vpop.f32.mrb[6].mxu0 }
 0x107   :  { %v2212_v41 = vadd.f32 %v1737_v40, %v1609_v28  ;;  %v188_v42 = vpop.f32.mrb[7].mxu0 }
 0x108   :  { %v2214_v43 = vadd.f32 %v1609_v28, %v188_v42 }
 0x10a   :  { %v393_v45 = vpop.f32.mrb[8].mxu0 }
 0x10b   :  { %v397_v46 = vadd.f32 %v393_v45, %v159_v44  ;;  %v1748_v47 = vpop.f32.mrb[9].mxu0 }
 0x10d   :  { %1933 = vtanh.f32 %v397_v46  ;;  %v1618_v49 = vmul.f32 -1.442695, %v397_v46 }
 0x10f   :  { %1935 = vpow2.f32 %v1618_v49 }
 0x117   :  { %v1934_v48 = vpop.eup %1933 }
 0x118   :  { %407 = vrot.lane.b32.xlu0 %v1934_v48, %s2051_s5 }
 0x119   :  { %v1936_v50 = vpop.eup %1935 }
 0x11a   :  { %v401_v51 = vadd.f32 1.0, %v1936_v50 }
 0x11c   :  { %1937 = vrcp.f32 %v401_v51 }
 0x126   :  { %v1938_v52 = vpop.eup %1937 }
 0x127   :  { %v405_v57 = vmul.f32 0.0, %v1938_v52 }
 0x18a   :  { %v408_v53 = vpop.permute.xlu0 %407 }
 0x18b   :  { %v410_v54 = vmul.f32 %v1938_v52, %v408_v53 }
 0x18d   :  { %412 = vrot.lane.b32.xlu0 %v410_v54, %s2052_s29 }
 0x191   :  { %263 = vperm.xlu0 %1932, %v253_v56  }
 0x1ff   :  { %v413_v58 = vpop.permute.xlu0 %412 }
 0x200   :  { %v415_v59 = vadd.f32 %v413_v58, %v405_v57 }
 0x202   :  { %1939 = vtanh.f32 %v415_v59 }
 0x20c   :  { %v1940_v60 = vpop.eup %1939 }
 0x20d   :  { %418 = vrot.lane.b32.xlu1 %v1940_v60, %s2051_s5 }
 0x210   :  { %v264_v2 = vpop.permute.xlu0 %263 }
 0x211   :  { %215 = vperm.xlu1 %1931, %v2225_v61  }
 0x27f   :  { %v419_v62 = vpop.permute.xlu1 %418 }
 0x280   :  { %v421_v63 = vmul.f32 %v1938_v52, %v419_v62 }
 0x282   :  { %424 = vrot.lane.b32.xlu1 %v421_v63, %s2052_s29 }
 0x286   :  { %432 = vrot.lane.b32.xlu1 %v415_v59, %s2054_s12 }
 0x290   :  { %v216_v3 = vpop.permute.xlu1 %215 }
 0x291   :  { %v302_v4 = vsel %vm301_vm2, %v216_v3, %v264_v2  ;;  %v2282_v3 = vld [vmem:[%s2511_s1 + $0x10] sm:$0xff] }
 0x292   :  { %311 = vst.msk [vmem:[#allocation5] sm:$0xff] %vm310_vm3, %v302_v4 }
 0x299   :  { %v422_v5 = vld [vmem:[#allocation5] sm:$0xff] }
 0x29a   :  { %v428_v6 = vsub.f32 1.0, %v422_v5 }
 0x29c   :  { %v429_v7 = vmul.f32 0.0, %v428_v6 }
 0x2f4   :  { %v425_v8 = vpop.permute.xlu1 %424 }
 0x2f5   :  { %v427_v9 = vmul.f32 %v425_v8, %v422_v5  ;;  %v255_v8 = vld [vmem:[%s2512_s2 + $0x10] sm:$0xff] }
 0x2f7   :  { %v2232_v10 = vadd.f32 %v429_v7, %v427_v9 }
 0x2f8   :  { %v433_v11 = vpop.permute.xlu1 %432 }
 0x2f9   :  { %437 = vst.msk [vmem:[#allocation3] sm:$0xff] %vm301_vm2, %v2232_v10  ;;  %v435_v12 = vmul.f32 %v433_v11, %v422_v5  ;;  %1758 = vmatmul.mubr.msk.f32.vlgmr.msra.gmra.mrb[0].mxu1 %vm310_vm3, %v2232_v10 }
 0x2fa   :  { %1876 = vmatpush3.bf16.msra.mxu1 %v2143_v13  ;;  %1768 = vmatprep.mubr.msk.f32.mxu1 %vm2049_vm0, %v2050_v1 }
 0x2fb   :  { %v436_v14 = vadd.f32 %v435_v12, %v429_v7  ;;  %1877 = vmatprep.subr.bf16.mxu1 %v2048_v0 }
 0x2fd   :  { %527 = vrot.lane.b32.xlu1 %v436_v14, %s2052_s29 }
 0x2fe   :  { %1879 = vmatpush3.bf16.msra.mxu1 %v2153_v19 }
 0x2ff   :  { %1886 = vmatprep.subr.bf16.mxu1 %v2048_v0 }
 0x36f   :  { %v528_v27 = vpop.permute.xlu1 %527 }
 0x3cc   :  { %v514_v15 = vpop.f32.mrb[0].mxu1 }
 0x3cd   :  { %v518_v16 = vadd.f32 %v514_v15, %v2202_v30  ;;  %v1759_v17 = vpop.f32.mrb[1].mxu1 }
 0x3cf   :  { %1941 = vtanh.f32 %v518_v16  ;;  %v1620_v20 = vmul.f32 -1.442695, %v518_v16 }
 0x3d1   :  { %1943 = vpow2.f32 %v1620_v20 }
 0x3d9   :  { %v1942_v18 = vpop.eup %1941 }
 0x3da   :  { %532 = vrot.lane.b32.xlu0 %v1942_v18, %s2051_s5 }
 0x3db   :  { %v1944_v21 = vpop.eup %1943 }
 0x3dc   :  { %v522_v22 = vadd.f32 1.0, %v1944_v21 }
 0x3de   :  { %1945 = vrcp.f32 %v522_v22 }
 0x3e8   :  { %v1946_v23 = vpop.eup %1945 }
 0x3e9   :  { %v530_v28 = vmul.f32 %v1946_v23, %v528_v27 }
 0x44c   :  { %v533_v24 = vpop.permute.xlu0 %532 }
 0x44d   :  { %v535_v25 = vmul.f32 %v1946_v23, %v533_v24 }
 0x44f   :  { %537 = vrot.lane.b32.xlu0 %v535_v25, %s2052_s29 }
 0x453   :  { %220 = vperm.xlu0 %1932, %v2251_v26  }
 0x4c1   :  { %v538_v29 = vpop.permute.xlu0 %537 }
 0x4c2   :  { %v540_v30 = vadd.f32 %v538_v29, %v530_v28 }
 0x4c4   :  { %1947 = vtanh.f32 %v540_v30 }
 0x4ce   :  { %v1948_v31 = vpop.eup %1947 }
 0x4cf   :  { %543 = vrot.lane.b32.xlu1 %v1948_v31, %s2051_s5 }
 0x4d2   :  { %v221_v38 = vpop.permute.xlu0 %220 }
 0x4d3   :  { %268 = vperm.xlu1 %1931, %v254_v32  }
 0x4d7   :  { %558 = vrot.lane.b32.xlu1 %v540_v30, %s2054_s12 }
 0x541   :  { %v544_v34 = vpop.permute.xlu1 %543 }
 0x542   :  { %v546_v36 = vmul.f32 %v1946_v23, %v544_v34 }
 0x544   :  { %550 = vrot.lane.b32.xlu0 %v546_v36, %s2052_s29 }
 0x552   :  { %v269_v40 = vpop.permute.xlu1 %268 }
 0x553   :  { %v303_v42 = vsel %vm301_vm2, %v221_v38, %v269_v40 }
 0x554   :  { %312 = vst.msk [vmem:[#allocation5 + $0x8] sm:$0xff] %vm310_vm3, %v303_v42 }
 0x556   :  { %v559_v46 = vpop.permute.xlu1 %558 }
 0x55b   :  { %v548_v44 = vld [vmem:[#allocation5 + $0x8] sm:$0xff] }
 0x55c   :  { %v554_v45 = vsub.f32 1.0, %v548_v44  ;;  %v561_v48 = vmul.f32 %v559_v46, %v548_v44 }
 0x55e   :  { %v562_v47 = vmul.f32 %v554_v45, %v436_v14  ;;  %v555_v52 = vmul.f32 %v554_v45, %v2232_v10 }
 0x560   :  { %v563_v49 = vadd.f32 %v562_v47, %v561_v48 }
 0x562   :  { %655 = vrot.lane.b32.xlu1 %v563_v49, %s2052_s29 }
 0x5b6   :  { %v551_v50 = vpop.permute.xlu0 %550 }
 0x5b7   :  { %v553_v51 = vmul.f32 %v551_v50, %v548_v44  ;;  %v2313_v44 = vld [vmem:[%s2511_s1 + $0x18] sm:$0xff] }
 0x5b9   :  { %v2264_v53 = vadd.f32 %v555_v52, %v553_v51 }
 0x5bb   :  { %565 = vst.msk [vmem:[#allocation3 + $0x8] sm:$0xff] %vm301_vm2, %v2264_v53  ;;  %1769 = vmatmul.mubr.msk.f32.vlgmr.msra.gmra.mrb[2].mxu1 %vm310_vm3, %v2264_v53 }
 0x5bc   :  { %1888 = vmatpush3.bf16.msra.mxu1 %v2143_v13  ;;  %1790 = vmatprep.mubr.msk.f32.mxu1 %vm2049_vm0, %v2050_v1 }
 0x5bd   :  { %1889 = vmatprep.subr.bf16.mxu1 %v2048_v0 }
 0x5c0   :  { %1891 = vmatpush3.bf16.msra.mxu1 %v2153_v19 }
 0x5c1   :  { %1898 = vmatprep.subr.bf16.mxu1 %v2048_v0 }
 0x68e   :  { %v642_v54 = vpop.f32.mrb[2].mxu1 }
 0x68f   :  { %v646_v55 = vadd.f32 %v642_v54, %v2206_v35  ;;  %v1770_v56 = vpop.f32.mrb[3].mxu1  ;;  %v656_v35 = vpop.permute.xlu1 %655 }
 0x691   :  { %1949 = vtanh.f32 %v646_v55  ;;  %v1622_v58 = vmul.f32 -1.442695, %v646_v55 }
 0x693   :  { %1951 = vpow2.f32 %v1622_v58 }
 0x69b   :  { %v1950_v57 = vpop.eup %1949 }
 0x69c   :  { %660 = vrot.lane.b32.xlu0 %v1950_v57, %s2051_s5 }
 0x69d   :  { %v1952_v59 = vpop.eup %1951 }
 0x69e   :  { %v650_v60 = vadd.f32 1.0, %v1952_v59 }
 0x6a0   :  { %1953 = vrcp.f32 %v650_v60 }
 0x6aa   :  { %v1954_v62 = vpop.eup %1953 }
 0x6ab   :  { %v658_v4 = vmul.f32 %v1954_v62, %v656_v35 }
 0x70e   :  { %v661_v63 = vpop.permute.xlu0 %660 }
 0x70f   :  { %v663_v2 = vmul.f32 %v1954_v62, %v661_v63 }
 0x711   :  { %665 = vrot.lane.b32.xlu0 %v663_v2, %s2052_s29 }
 0x715   :  { %225 = vperm.xlu0 %1932, %v2282_v3  }
 0x783   :  { %v666_v5 = vpop.permute.xlu0 %665 }
 0x784   :  { %v668_v6 = vadd.f32 %v666_v5, %v658_v4 }
 0x786   :  { %1955 = vtanh.f32 %v668_v6 }
 0x790   :  { %v1956_v7 = vpop.eup %1955 }
 0x791   :  { %671 = vrot.lane.b32.xlu1 %v1956_v7, %s2051_s5 }
 0x794   :  { %v226_v12 = vpop.permute.xlu0 %225 }
 0x795   :  { %273 = vperm.xlu1 %1931, %v255_v8  }
 0x799   :  { %686 = vrot.lane.b32.xlu1 %v668_v6, %s2054_s12 }
 0x803   :  { %v672_v9 = vpop.permute.xlu1 %671 }
 0x804   :  { %v674_v11 = vmul.f32 %v1954_v62, %v672_v9 }
 0x806   :  { %678 = vrot.lane.b32.xlu0 %v674_v11, %s2052_s29 }
 0x814   :  { %v274_v14 = vpop.permute.xlu1 %273 }
 0x815   :  { %v304_v15 = vsel %vm301_vm2, %v226_v12, %v274_v14 }
 0x816   :  { %313 = vst.msk [vmem:[#allocation5 + $0x10] sm:$0xff] %vm310_vm3, %v304_v15 }
 0x818   :  { %v687_v18 = vpop.permute.xlu1 %686 }
 0x81d   :  { %v676_v16 = vld [vmem:[#allocation5 + $0x10] sm:$0xff] }
 0x81e   :  { %v682_v17 = vsub.f32 1.0, %v676_v16  ;;  %v689_v21 = vmul.f32 %v687_v18, %v676_v16 }
 0x820   :  { %v690_v20 = vmul.f32 %v682_v17, %v563_v49  ;;  %v683_v25 = vmul.f32 %v682_v17, %v2264_v53  ;;  %v256_v49 = vld [vmem:[%s2512_s2 + $0x18] sm:$0xff]  ;;  %v2343_v17 = vld [vmem:[%s2511_s1 + $0x20] sm:$0xff] }
 0x822   :  { %v691_v22 = vadd.f32 %v690_v20, %v689_v21 }
 0x824   :  { %783 = vrot.lane.b32.xlu1 %v691_v22, %s2052_s29 }
 0x878   :  { %v679_v23 = vpop.permute.xlu0 %678 }
 0x879   :  { %v681_v24 = vmul.f32 %v679_v23, %v676_v16  ;;  %v257_v23 = vld [vmem:[%s2512_s2 + $0x20] sm:$0xff] }
 0x87b   :  { %v2295_v27 = vadd.f32 %v683_v25, %v681_v24 }
 0x87d   :  { %693 = vst.msk [vmem:[#allocation3 + $0x10] sm:$0xff] %vm301_vm2, %v2295_v27  ;;  %1780 = vmatmul.mubr.msk.f32.vlgmr.msra.gmra.mrb[10].mxu0 %vm310_vm3, %v2295_v27 }
 0x87e   :  { %1894 = vmatpush3.bf16.msra.mxu0 %v2143_v13  ;;  %1801 = vmatprep.mubr.msk.f32.mxu0 %vm2049_vm0, %v2050_v1 }
 0x87f   :  { %1895 = vmatprep.subr.bf16.mxu0 %v2048_v0 }
 0x882   :  { %1897 = vmatpush3.bf16.msra.mxu0 %v2153_v19 }
 0x883   :  { %1904 = vmatprep.subr.bf16.mxu0 %v2048_v0 }
 0x950   :  { %v770_v28 = vpop.f32.mrb[10].mxu0 }
 0x951   :  { %v774_v29 = vadd.f32 %v770_v28, %v2204_v33  ;;  %v1781_v30 = vpop.f32.mrb[11].mxu0  ;;  %v784_v33 = vpop.permute.xlu1 %783 }
 0x953   :  { %1957 = vtanh.f32 %v774_v29  ;;  %v1624_v32 = vmul.f32 -1.442695, %v774_v29 }
 0x955   :  { %1959 = vpow2.f32 %v1624_v32 }
 0x95d   :  { %v1958_v31 = vpop.eup %1957 }
 0x95e   :  { %788 = vrot.lane.b32.xlu0 %v1958_v31, %s2051_s5 }
 0x95f   :  { %v1960_v34 = vpop.eup %1959 }
 0x960   :  { %v778_v36 = vadd.f32 1.0, %v1960_v34 }
 0x962   :  { %1961 = vrcp.f32 %v778_v36 }
 0x96c   :  { %v1962_v38 = vpop.eup %1961 }
 0x96d   :  { %v786_v45 = vmul.f32 %v1962_v38, %v784_v33 }
 0x9d0   :  { %v789_v40 = vpop.permute.xlu0 %788 }
 0x9d1   :  { %v791_v42 = vmul.f32 %v1962_v38, %v789_v40 }
 0x9d3   :  { %793 = vrot.lane.b32.xlu0 %v791_v42, %s2052_s29 }
 0x9d7   :  { %230 = vperm.xlu0 %1932, %v2313_v44  }
 0xa45   :  { %v794_v46 = vpop.permute.xlu0 %793 }
 0xa46   :  { %v796_v47 = vadd.f32 %v794_v46, %v786_v45 }
 0xa48   :  { %1963 = vtanh.f32 %v796_v47 }
 0xa52   :  { %v1964_v48 = vpop.eup %1963 }
 0xa53   :  { %799 = vrot.lane.b32.xlu1 %v1964_v48, %s2051_s5 }
 0xa56   :  { %v231_v52 = vpop.permute.xlu0 %230 }
 0xa57   :  { %278 = vperm.xlu1 %1931, %v256_v49  }
 0xa5b   :  { %814 = vrot.lane.b32.xlu1 %v796_v47, %s2054_s12 }
 0xac5   :  { %v800_v50 = vpop.permute.xlu1 %799 }
 0xac6   :  { %v802_v51 = vmul.f32 %v1962_v38, %v800_v50 }
 0xac8   :  { %806 = vrot.lane.b32.xlu0 %v802_v51, %s2052_s29 }
 0xad6   :  { %v279_v54 = vpop.permute.xlu1 %278 }
 0xad7   :  { %v305_v55 = vsel %vm301_vm2, %v231_v52, %v279_v54 }
 0xad8   :  { %314 = vst.msk [vmem:[#allocation5 + $0x18] sm:$0xff] %vm310_vm3, %v305_v55 }
 0xada   :  { %v815_v58 = vpop.permute.xlu1 %814 }
 0xadf   :  { %v804_v56 = vld [vmem:[#allocation5 + $0x18] sm:$0xff] }
 0xae0   :  { %v810_v57 = vsub.f32 1.0, %v804_v56  ;;  %v817_v60 = vmul.f32 %v815_v58, %v804_v56 }
 0xae2   :  { %v818_v59 = vmul.f32 %v810_v57, %v691_v22  ;;  %v811_v35 = vmul.f32 %v810_v57, %v2295_v27 }
 0xae4   :  { %v819_v62 = vadd.f32 %v818_v59, %v817_v60  ;;  %v258_v59 = vld [vmem:[%s2512_s2 + $0x28] sm:$0xff] }
 0xae6   :  { %911 = vrot.lane.b32.xlu1 %v819_v62, %s2052_s29 }
 0xb3a   :  { %v807_v63 = vpop.permute.xlu0 %806 }
 0xb3b   :  { %v809_v2 = vmul.f32 %v807_v63, %v804_v56 }
 0xb3d   :  { %v2326_v4 = vadd.f32 %v811_v35, %v809_v2 }
 0xb3f   :  { %821 = vst.msk [vmem:[#allocation3 + $0x18] sm:$0xff] %vm301_vm2, %v2326_v4  ;;  %1791 = vmatmul.mubr.msk.f32.vlgmr.msra.gmra.mrb[4].mxu1 %vm310_vm3, %v2326_v4 }
 0xb40   :  { %1900 = vmatpush3.bf16.msra.mxu1 %v2143_v13  ;;  %1812 = vmatprep.mubr.msk.f32.mxu1 %vm2049_vm0, %v2050_v1 }
 0xb41   :  { %1901 = vmatprep.subr.bf16.mxu1 %v2048_v0 }
 0xb44   :  { %1903 = vmatpush3.bf16.msra.mxu1 %v2153_v19 }
 0xc12   :  { %v898_v5 = vpop.f32.mrb[4].mxu1 }
 0xc13   :  { %v902_v6 = vadd.f32 %v898_v5, %v2210_v39  ;;  %v1792_v7 = vpop.f32.mrb[5].mxu1  ;;  %v912_v39 = vpop.permute.xlu1 %911 }
 0xc15   :  { %1965 = vtanh.f32 %v902_v6  ;;  %v1626_v9 = vmul.f32 -1.442695, %v902_v6 }
 0xc17   :  { %1967 = vpow2.f32 %v1626_v9 }
 0xc1f   :  { %v1966_v8 = vpop.eup %1965 }
 0xc20   :  { %916 = vrot.lane.b32.xlu0 %v1966_v8, %s2051_s5 }
 0xc21   :  { %v1968_v11 = vpop.eup %1967 }
 0xc22   :  { %v906_v12 = vadd.f32 1.0, %v1968_v11 }
 0xc24   :  { %1969 = vrcp.f32 %v906_v12 }
 0xc2e   :  { %v1970_v14 = vpop.eup %1969 }
 0xc2f   :  { %v914_v18 = vmul.f32 %v1970_v14, %v912_v39 }
 0xc92   :  { %v917_v15 = vpop.permute.xlu0 %916 }
 0xc93   :  { %v919_v16 = vmul.f32 %v1970_v14, %v917_v15 }
 0xc95   :  { %921 = vrot.lane.b32.xlu0 %v919_v16, %s2052_s29 }
 0xc99   :  { %235 = vperm.xlu0 %1932, %v2343_v17  }
 0xd07   :  { %v922_v20 = vpop.permute.xlu0 %921 }
 0xd08   :  { %v924_v21 = vadd.f32 %v922_v20, %v914_v18 }
 0xd0a   :  { %1971 = vtanh.f32 %v924_v21 }
 0xd14   :  { %v1972_v22 = vpop.eup %1971 }
 0xd15   :  { %927 = vrot.lane.b32.xlu1 %v1972_v22, %s2051_s5 }
 0xd18   :  { %v236_v28 = vpop.permute.xlu0 %235 }
 0xd19   :  { %283 = vperm.xlu1 %1931, %v257_v23  }
 0xd1d   :  { %942 = vrot.lane.b32.xlu1 %v924_v21, %s2054_s12 }
 0xd87   :  { %v928_v24 = vpop.permute.xlu1 %927 }
 0xd88   :  { %v930_v25 = vmul.f32 %v1970_v14, %v928_v24 }
 0xd8a   :  { %934 = vrot.lane.b32.xlu0 %v930_v25, %s2052_s29 }
 0xd98   :  { %v284_v29 = vpop.permute.xlu1 %283 }
 0xd99   :  { %v306_v30 = vsel %vm301_vm2, %v236_v28, %v284_v29 }
 0xd9a   :  { %315 = vst.msk [vmem:[#allocation5 + $0x20] sm:$0xff] %vm310_vm3, %v306_v30  ;;  %v2398_v30 = vld [vmem:[%s2511_s1 + $0x30] sm:$0xff] }
 0xd9c   :  { %v943_v34 = vpop.permute.xlu1 %942 }
 0xda1   :  { %v932_v31 = vld [vmem:[#allocation5 + $0x20] sm:$0xff] }
 0xda2   :  { %v938_v32 = vsub.f32 1.0, %v932_v31  ;;  %v945_v38 = vmul.f32 %v943_v34, %v932_v31 }
 0xda4   :  { %v946_v36 = vmul.f32 %v938_v32, %v819_v62  ;;  %v939_v45 = vmul.f32 %v938_v32, %v2326_v4 }
 0xda6   :  { %v947_v40 = vadd.f32 %v946_v36, %v945_v38  ;;  %v259_v38 = vld [vmem:[%s2512_s2 + $0x30] sm:$0xff] }
 0xda8   :  { %1039 = vrot.lane.b32.xlu1 %v947_v40, %s2052_s29 }
 0xdfc   :  { %v935_v42 = vpop.permute.xlu0 %934 }
 0xdfd   :  { %v937_v33 = vmul.f32 %v935_v42, %v932_v31 }
 0xdff   :  { %v2356_v46 = vadd.f32 %v939_v45, %v937_v33 }
 0xe01   :  { %949 = vst.msk [vmem:[#allocation3 + $0x20] sm:$0xff] %vm301_vm2, %v2356_v46  ;;  %1802 = vmatmul.mubr.msk.f32.vlgmr.msra.gmra.mrb[12].mxu0 %vm310_vm3, %v2356_v46 }
 0xe02   :  { %1906 = vmatpush3.bf16.msra.mxu0 %v2143_v13  ;;  %1823 = vmatprep.mubr.msk.f32.mxu0 %vm2049_vm0, %v2050_v1 }
 0xe03   :  { %1907 = vmatprep.subr.bf16.mxu0 %v2048_v0  ;;  %v2373_v0 = vld [vmem:[%s2511_s1 + $0x28] sm:$0xff] }
 0xe06   :  { %1909 = vmatpush3.bf16.msra.mxu0 %v2153_v19 }
 0xe1a   :  { %v1040_v19 = vpop.permute.xlu1 %1039 }
 0xed4   :  { %v1026_v47 = vpop.f32.mrb[12].mxu0 }
 0xed5   :  { %v1030_v48 = vadd.f32 %v1026_v47, %v2208_v37  ;;  %v1803_v49 = vpop.f32.mrb[13].mxu0 }
 0xed7   :  { %1973 = vtanh.f32 %v1030_v48  ;;  %v1628_v51 = vmul.f32 -1.442695, %v1030_v48 }
 0xed9   :  { %1975 = vpow2.f32 %v1628_v51 }
 0xee1   :  { %v1974_v50 = vpop.eup %1973 }
 0xee2   :  { %1044 = vrot.lane.b32.xlu0 %v1974_v50, %s2051_s5 }
 0xee3   :  { %v1976_v52 = vpop.eup %1975 }
 0xee4   :  { %v1034_v54 = vadd.f32 1.0, %v1976_v52 }
 0xee6   :  { %1977 = vrcp.f32 %v1034_v54 }
 0xef0   :  { %v1978_v13 = vpop.eup %1977 }
 0xef1   :  { %v1042_v37 = vmul.f32 %v1978_v13, %v1040_v19 }
 0xf54   :  { %v1045_v55 = vpop.permute.xlu0 %1044 }
 0xf55   :  { %v1047_v1 = vmul.f32 %v1978_v13, %v1045_v55 }
 0xf57   :  { %1049 = vrot.lane.b32.xlu0 %v1047_v1, %s2052_s29 }
 0xf5b   :  { %240 = vperm.xlu0 %1932, %v2373_v0  }
 0xfc9   :  { %v1050_v56 = vpop.permute.xlu0 %1049 }
 0xfca   :  { %v1052_v57 = vadd.f32 %v1050_v56, %v1042_v37 }
 0xfcc   :  { %1979 = vtanh.f32 %v1052_v57 }
 0xfd6   :  { %v1980_v58 = vpop.eup %1979 }
 0xfd7   :  { %1055 = vrot.lane.b32.xlu1 %v1980_v58, %s2051_s5 }
 0xfda   :  { %v241_v63 = vpop.permute.xlu0 %240 }
 0xfdb   :  { %288 = vperm.xlu1 %1931, %v258_v59  }
 0xfdf   :  { %1070 = vrot.lane.b32.xlu1 %v1052_v57, %s2054_s12 }
0x1049   :  { %v1056_v60 = vpop.permute.xlu1 %1055 }
0x104a   :  { %v1058_v62 = vmul.f32 %v1978_v13, %v1056_v60 }
0x104c   :  { %1062 = vrot.lane.b32.xlu0 %v1058_v62, %s2052_s29 }
0x105a   :  { %v289_v2 = vpop.permute.xlu1 %288 }
0x105b   :  { %v307_v35 = vsel %vm301_vm2, %v241_v63, %v289_v2 }
0x105c   :  { %316 = vst.msk [vmem:[#allocation5 + $0x28] sm:$0xff] %vm310_vm3, %v307_v35 }
0x105e   :  { %v1071_v7 = vpop.permute.xlu1 %1070 }
0x1063   :  { %v1060_v5 = vld [vmem:[#allocation5 + $0x28] sm:$0xff] }
0x1064   :  { %v1066_v6 = vsub.f32 1.0, %v1060_v5  ;;  %v1073_v9 = vmul.f32 %v1071_v7, %v1060_v5 }
0x1066   :  { %v1074_v8 = vmul.f32 %v1066_v6, %v947_v40  ;;  %v1067_v15 = vmul.f32 %v1066_v6, %v2356_v46 }
0x1068   :  { %v1075_v11 = vadd.f32 %v1074_v8, %v1073_v9 }
0x106a   :  { %1167 = vrot.lane.b32.xlu1 %v1075_v11, %s2052_s29 }
0x10be   :  { %v1063_v12 = vpop.permute.xlu0 %1062 }
0x10bf   :  { %v1065_v14 = vmul.f32 %v1063_v12, %v1060_v5  ;;  %v212_v5 = vld [vmem:[%s2511_s1 + $0x38] sm:$0xff]  ;;  %s2056_s1 = smov 16  }
0x10c1   :  { %v2386_v16 = vadd.f32 %v1067_v15, %v1065_v14 }
0x10c3   :  { %1077 = vst.msk [vmem:[#allocation3 + $0x28] sm:$0xff] %vm301_vm2, %v2386_v16  ;;  %1813 = vmatmul.mubr.msk.f32.vlgmr.msra.gmra.mrb[6].mxu1 %vm310_vm3, %v2386_v16 }
0x1196   :  { %v1154_v39 = vpop.f32.mrb[6].mxu1 }
0x1197   :  { %v1158_v18 = vadd.f32 %v1154_v39, %v2214_v43  ;;  %v1814_v20 = vpop.f32.mrb[7].mxu1  ;;  %v1168_v43 = vpop.permute.xlu1 %1167 }
0x1199   :  { %1981 = vtanh.f32 %v1158_v18  ;;  %v1630_v22 = vmul.f32 -1.442695, %v1158_v18 }
0x119b   :  { %1983 = vpow2.f32 %v1630_v22 }
0x11a3   :  { %v1982_v21 = vpop.eup %1981 }
0x11a4   :  { %1172 = vrot.lane.b32.xlu0 %v1982_v21, %s2051_s5 }
0x11a5   :  { %v1984_v23 = vpop.eup %1983 }
0x11a6   :  { %v1162_v24 = vadd.f32 1.0, %v1984_v23 }
0x11a8   :  { %1985 = vrcp.f32 %v1162_v24 }
0x11b2   :  { %v1986_v25 = vpop.eup %1985 }
0x11b3   :  { %v1170_v31 = vmul.f32 %v1986_v25, %v1168_v43 }
0x1216   :  { %v1173_v28 = vpop.permute.xlu0 %1172 }
0x1217   :  { %v1175_v29 = vmul.f32 %v1986_v25, %v1173_v28 }
0x1219   :  { %1177 = vrot.lane.b32.xlu0 %v1175_v29, %s2052_s29 }
0x121d   :  { %245 = vperm.xlu0 %1932, %v2398_v30  }
0x128b   :  { %v1178_v32 = vpop.permute.xlu0 %1177 }
0x128c   :  { %v1180_v34 = vadd.f32 %v1178_v32, %v1170_v31  ;;  %v1390_v32 = vld [vmem:[%s2516_s6 + $0x10] sm:$0xff] }
0x128e   :  { %1987 = vtanh.f32 %v1180_v34 }
0x1298   :  { %v1988_v36 = vpop.eup %1987 }
0x1299   :  { %1183 = vrot.lane.b32.xlu1 %v1988_v36, %s2051_s5 }
0x129c   :  { %v246_v33 = vpop.permute.xlu0 %245 }
0x129d   :  { %293 = vperm.xlu1 %1931, %v259_v38  }
0x12a1   :  { %1198 = vrot.lane.b32.xlu1 %v1180_v34, %s2054_s12 }
0x130b   :  { %v1184_v40 = vpop.permute.xlu1 %1183 }
0x130c   :  { %v1186_v42 = vmul.f32 %v1986_v25, %v1184_v40 }
0x130e   :  { %1190 = vrot.lane.b32.xlu0 %v1186_v42, %s2052_s29 }
0x131c   :  { %v294_v45 = vpop.permute.xlu1 %293 }
0x131d   :  { %v308_v47 = vsel %vm301_vm2, %v246_v33, %v294_v45 }
0x131e   :  { %317 = vst.msk [vmem:[#allocation5 + $0x30] sm:$0xff] %vm310_vm3, %v308_v47 }
0x1320   :  { %v1199_v50 = vpop.permute.xlu1 %1198 }
0x1325   :  { %v1188_v48 = vld [vmem:[#allocation5 + $0x30] sm:$0xff] }
0x1326   :  { %v1194_v49 = vsub.f32 1.0, %v1188_v48  ;;  %v1201_v52 = vmul.f32 %v1199_v50, %v1188_v48  ;;  %v1332_v50 = vld [vmem:[#allocation3] sm:$0xff] }
0x1328   :  { %v1202_v51 = vmul.f32 %v1194_v49, %v1075_v11  ;;  %v1195_v1 = vmul.f32 %v1194_v49, %v2386_v16  ;;  %v260_v11 = vld [vmem:[%s2512_s2 + $0x38] sm:$0xff] }
0x132a   :  { %v1203_v54 = vadd.f32 %v1202_v51, %v1201_v52  ;;  %v1333_v52 = vld [vmem:[#allocation3 + $0x8] sm:$0xff] }
0x132c   :  { %1295 = vrot.lane.b32.xlu1 %v1203_v54, %s2052_s29 }
0x1380   :  { %v1191_v13 = vpop.permute.xlu0 %1190 }
0x1381   :  { %v1193_v55 = vmul.f32 %v1191_v13, %v1188_v48 }
0x1383   :  { %v1196_v19 = vadd.f32 %v1195_v1, %v1193_v55 }
0x1385   :  { %1205 = vst.msk [vmem:[#allocation3 + $0x30] sm:$0xff] %vm301_vm2, %v1196_v19  ;;  %1824 = vmatmul.mubr.msk.f32.vlgmr.msra.gmra.mrb[14].mxu0 %vm310_vm3, %v1196_v19 }
0x1458   :  { %v1282_v37 = vpop.f32.mrb[14].mxu0 }
0x1459   :  { %v1286_v56 = vadd.f32 %v1282_v37, %v2212_v41  ;;  %v1825_v57 = vpop.f32.mrb[15].mxu0  ;;  %v1296_v41 = vpop.permute.xlu1 %1295 }
0x145b   :  { %1989 = vtanh.f32 %v1286_v56  ;;  %v1632_v59 = vmul.f32 -1.442695, %v1286_v56  ;;  %v1337_v56 = vld [vmem:[#allocation3 + $0x28] sm:$0xff] }
0x145d   :  { %1991 = vpow2.f32 %v1632_v59 }
0x1465   :  { %v1990_v58 = vpop.eup %1989 }
0x1466   :  { %1300 = vrot.lane.b32.xlu0 %v1990_v58, %s2051_s5 }
0x1467   :  { %v1992_v60 = vpop.eup %1991 }
0x1468   :  { %v1290_v62 = vadd.f32 1.0, %v1992_v60  ;;  %v1338_v60 = vld [vmem:[#allocation3 + $0x30] sm:$0xff] }
0x146a   :  { %1993 = vrcp.f32 %v1290_v62 }
0x1474   :  { %v1994_v63 = vpop.eup %1993 }
0x1475   :  { %v1298_v6 = vmul.f32 %v1994_v63, %v1296_v41 }
0x14d8   :  { %v1301_v2 = vpop.permute.xlu0 %1300 }
0x14d9   :  { %v1303_v35 = vmul.f32 %v1994_v63, %v1301_v2 }
0x14db   :  { %1305 = vrot.lane.b32.xlu0 %v1303_v35, %s2052_s29 }
0x14df   :  { %250 = vperm.xlu0 %1932, %v212_v5  }
0x154d   :  { %v1306_v7 = vpop.permute.xlu0 %1305 }
0x154e   :  { %v1308_v8 = vadd.f32 %v1306_v7, %v1298_v6  ;;  %v1633_v6 = vld [vmem:[%s2517_s7] ss:$0 sm:$0xff]  ;;  %s2057_s7 = smov [#allocation9]  }
0x154f   :  { %s1597_s26 = sshll.u32 %s2057_s7, 4  ;;  %s1598_s26 = int_to_ptr.vmem [resolvable:$true] %s1597_s26 }
0x1550   :  { %1995 = vtanh.f32 %v1308_v8  ;;  %s2019_s27 = scalar_lea.vmem %s1598_s26, 1024  ;;  %p2024_p9 = scmp.lt.s32.totalorder %s1598_s26, %s1598_s26 }
0x1551   :  { %p2020_p8 = scmp.ne.s32.totalorder %s1598_s26, %s2019_s27  ;;  %p2025_p10 = scmp.lt.s32.totalorder %s2019_s27, %s2019_s27 }
0x1553   :  { %p2026_p11 = por %p2025_p10, %p2024_p9 }
0x1555   :  { %p2027_p12 = pnand %p2026_p11, %p2020_p8 }
0x155a   :  { %v1996_v9 = vpop.eup %1995 }
0x155b   :  { %1311 = vrot.lane.b32.xlu1 %v1996_v9, %s2051_s5 }
0x155e   :  { %v251_v15 = vpop.permute.xlu0 %250 }
0x155f   :  { %298 = vperm.xlu1 %1931, %v260_v11  }
0x15cd   :  { %v1312_v12 = vpop.permute.xlu1 %1311 }
0x15ce   :  { %v1314_v14 = vmul.f32 %v1994_v63, %v1312_v12 }
0x15d0   :  { %1318 = vrot.lane.b32.xlu0 %v1314_v14, %s2052_s29 }
0x15d4   :  { %1207 = vrot.lane.b32.xlu0 %v1196_v19, %s2055_s20 }
0x15d8   :  { %951 = vrot.lane.b32.xlu0 %v2356_v46, %s2055_s20 }
0x15dc   :  { %695 = vrot.lane.b32.xlu0 %v2295_v27, %s2055_s20 }
0x15de   :  { %v299_v39 = vpop.permute.xlu1 %298 }
0x15df   :  { %v309_v18 = vsel %vm301_vm2, %v251_v15, %v299_v39 }
0x15e0   :  { %318 = vst.msk [vmem:[#allocation5 + $0x38] sm:$0xff] %vm310_vm3, %v309_v18  ;;  %439 = vrot.lane.b32.xlu0 %v2232_v10, %s2055_s20 }
0x15e7   :  { %v1316_v20 = vld [vmem:[#allocation5 + $0x38] sm:$0xff] }
0x15e8   :  { %v1322_v21 = vsub.f32 1.0, %v1316_v20 }
0x15ea   :  { %v1323_v24 = vmul.f32 %v1322_v21, %v1196_v19  ;;  %v1336_v19 = vld [vmem:[#allocation3 + $0x20] sm:$0xff] }
0x1642   :  { %v1319_v22 = vpop.permute.xlu0 %1318 }
0x1643   :  { %v1321_v23 = vmul.f32 %v1319_v22, %v1316_v20 }
0x1645   :  { %v1324_v25 = vadd.f32 %v1323_v24, %v1321_v23 }
0x1646   :  { %v1208_v28 = vpop.permute.xlu0 %1207 }
0x1647   :  { %1326 = vst.msk [vmem:[#allocation3 + $0x38] sm:$0xff] %vm301_vm2, %v1324_v25  ;;  %1211 = vst.msk [vmem:[#allocation4 + $0x8] sm:$0xff] %vm301_vm2, %v1208_v28  ;;  %1328 = vrot.lane.b32.xlu1 %v1324_v25, %s2055_s20 }
0x164a   :  { %v952_v27 = vpop.permute.xlu0 %951 }
0x164b   :  { %955 = vst.msk [vmem:[#allocation4 + $0x18] sm:$0xff] %vm301_vm2, %v952_v27  ;;  %1079 = vrot.lane.b32.xlu1 %v2386_v16, %s2055_s20 }
0x164e   :  { %v696_v10 = vpop.permute.xlu0 %695  ;;  %v1341_v46 = vld [vmem:[#allocation4 + $0x8] sm:$0xff]  ;;  %v1339_v63 = vld [vmem:[#allocation3 + $0x38] sm:$0xff] }
0x164f   :  { %699 = vst.msk [vmem:[#allocation4 + $0x28] sm:$0xff] %vm301_vm2, %v696_v10  ;;  %1358 = vrot.lane.b32.xlu0 %v1341_v46, %s2056_s1  ;;  %823 = vrot.lane.b32.xlu1 %v2326_v4, %s2055_s20  ;;  %v1388_v4 = vld [vmem:[%s2516_s6] sm:$0xff] }
0x1652   :  { %v440_v29 = vpop.permute.xlu0 %439  ;;  %v1343_v43 = vld [vmem:[#allocation4 + $0x18] sm:$0xff] }
0x1653   :  { %443 = vst.msk [vmem:[#allocation4 + $0x38] sm:$0xff] %vm301_vm2, %v440_v29  ;;  %1362 = vrot.lane.b32.xlu0 %v1343_v43, %s2056_s1  ;;  %567 = vrot.lane.b32.xlu1 %v2264_v53, %s2055_s20  ;;  %v1389_v53 = vld [vmem:[%s2516_s6 + $0x8] sm:$0xff] }
0x1654   :  { %v1910_v34 = vpack.c.bf16 %v1389_v53, %v1388_v4 }
0x1656   :  { %v1345_v16 = vld [vmem:[#allocation4 + $0x28] sm:$0xff]  ;;  %1911 = vmatprep.subr.bf16.mxu1 %v1910_v34 }
0x1657   :  { %1366 = vrot.lane.b32.xlu0 %v1345_v16, %s2056_s1  ;;  %1913 = vmatpush3.bf16.msra.mxu1 %v1910_v34 }
0x165a   :  { %v1347_v31 = vld [vmem:[#allocation4 + $0x38] sm:$0xff] }
0x165b   :  { %1370 = vrot.lane.b32.xlu0 %v1347_v31, %s2056_s1 }
0x165f   :  { %1543 = vperm.xlu0 %1932, %v2251_v26   ;;  %v1391_v26 = vld [vmem:[%s2516_s6 + $0x18] sm:$0xff] }
0x1663   :  { %1553 = vperm.xlu0 %1932, %v2313_v44   ;;  %v1914_v44 = vpack.c.bf16 %v1391_v26, %v1390_v32 }
0x1665   :  { %1915 = vmatprep.subr.bf16.mxu1 %v1914_v44 }
0x1666   :  { %1917 = vmatpush3.bf16.msra.mxu1 %v1914_v44 }
0x1667   :  { %1563 = vperm.xlu0 %1932, %v2373_v0  }
0x166b   :  { %1573 = vperm.xlu0 %1932, %v212_v5  }
0x16b9   :  { %v1329_v0 = vpop.permute.xlu1 %1328 }
0x16ba   :  { %1331 = vst.msk [vmem:[#allocation4] sm:$0xff] %vm301_vm2, %v1329_v0 }
0x16bd   :  { %v1080_v36 = vpop.permute.xlu1 %1079 }
0x16be   :  { %1083 = vst.msk [vmem:[#allocation4 + $0x10] sm:$0xff] %vm301_vm2, %v1080_v36 }
0x16c1   :  { %v824_v38 = vpop.permute.xlu1 %823  ;;  %v1340_v40 = vld [vmem:[#allocation4] sm:$0xff]  ;;  %v1359_v48 = vpop.permute.xlu0 %1358 }
0x16c2   :  { %827 = vst.msk [vmem:[#allocation4 + $0x20] sm:$0xff] %vm301_vm2, %v824_v38  ;;  %1356 = vrot.lane.b32.xlu1 %v1340_v40, %s2056_s1  ;;  %v1381_v13 = vsel %vm301_vm2, %v1333_v52, %v1359_v48 }
0x16c5   :  { %v568_v42 = vpop.permute.xlu1 %567  ;;  %v1342_v33 = vld [vmem:[#allocation4 + $0x10] sm:$0xff]  ;;  %v1363_v49 = vpop.permute.xlu0 %1362 }
0x16c6   :  { %571 = vst.msk [vmem:[#allocation4 + $0x30] sm:$0xff] %vm301_vm2, %v568_v42  ;;  %1360 = vrot.lane.b32.xlu1 %v1342_v33, %s2056_s1 }
0x16c9   :  { %v1344_v45 = vld [vmem:[#allocation4 + $0x20] sm:$0xff]  ;;  %v1367_v1 = vpop.permute.xlu0 %1366 }
0x16ca   :  { %1364 = vrot.lane.b32.xlu1 %v1344_v45, %s2056_s1  ;;  %v1385_v58 = vsel %vm301_vm2, %v1337_v56, %v1367_v1 }
0x16cd   :  { %v1346_v47 = vld [vmem:[#allocation4 + $0x30] sm:$0xff]  ;;  %v1371_v59 = vpop.permute.xlu0 %1370 }
0x16ce   :  { %1368 = vrot.lane.b32.xlu1 %v1346_v47, %s2056_s1  ;;  %v1387_v35 = vsel %vm301_vm2, %v1339_v63, %v1371_v59 }
0x16d2   :  { %1538 = vperm.xlu1 %1931, %v2225_v61   ;;  %v1334_v61 = vld [vmem:[#allocation3 + $0x10] sm:$0xff] }
0x16d6   :  { %1548 = vperm.xlu1 %1931, %v2282_v3   ;;  %v1335_v3 = vld [vmem:[#allocation3 + $0x18] sm:$0xff] }
0x16da   :  { %1558 = vperm.xlu1 %1931, %v2343_v17  }
0x16de   :  { %1568 = vperm.xlu1 %1931, %v2398_v30   ;;  %v1383_v30 = vsel %vm301_vm2, %v1335_v3, %v1363_v49  ;;  %v1544_v5 = vpop.permute.xlu0 %1543 }
0x16e2   :  { %v1554_v11 = vpop.permute.xlu0 %1553 }
0x16e6   :  { %v1564_v24 = vpop.permute.xlu0 %1563 }
0x16ea   :  { %v1574_v32 = vpop.permute.xlu0 %1573 }
0x1734   :  { %v1357_v51 = vpop.permute.xlu1 %1356 }
0x1735   :  { %v1380_v54 = vsel %vm301_vm2, %v1332_v50, %v1357_v51 }
0x1736   :  { %1834 = vmatprep.mubr.msk.f32.mxu1 %vm310_vm3, %v1380_v54 }
0x1737   :  { %1835 = vmatmul.mubr.msk.f32.vlgmr.msra.gmra.mrb[8].mxu1 %vm310_vm3, %v1381_v13 }
0x1738   :  { %v1361_v55 = vpop.permute.xlu1 %1360 }
0x1739   :  { %v1382_v17 = vsel %vm301_vm2, %v1334_v61, %v1361_v55 }
0x173a   :  { %1837 = vmatprep.mubr.msk.f32.mxu1 %vm310_vm3, %v1382_v17 }
0x173b   :  { %1838 = vmatmul.mubr.msk.f32.gmra.mrb[10].mxu1 %vm310_vm3, %v1383_v30 }
0x173c   :  { %v1365_v37 = vpop.permute.xlu1 %1364 }
0x173d   :  { %v1384_v57 = vsel %vm301_vm2, %v1336_v19, %v1365_v37 }
0x173e   :  { %1840 = vmatprep.mubr.msk.f32.mxu1 %vm310_vm3, %v1384_v57 }
0x173f   :  { %1841 = vmatmul.mubr.msk.f32.gmra.mrb[12].mxu1 %vm310_vm3, %v1385_v58 }
0x1740   :  { %v1369_v62 = vpop.permute.xlu1 %1368 }
0x1741   :  { %v1386_v2 = vsel %vm301_vm2, %v1338_v60, %v1369_v62 }
0x1742   :  { %1843 = vmatprep.mubr.msk.f32.mxu1 %vm310_vm3, %v1386_v2 }
0x1743   :  { %1844 = vmatmul.mubr.msk.f32.gmra.mrb[14].mxu1 %vm310_vm3, %v1387_v35 }
0x1751   :  { %v1539_v41 = vpop.permute.xlu1 %1538 }
0x1755   :  { %v1549_v14 = vpop.permute.xlu1 %1548 }
0x1759   :  { %v1559_v27 = vpop.permute.xlu1 %1558 }
0x175d   :  { %v1569_v26 = vpop.permute.xlu1 %1568 }
0x180a   :  { %v1836_v7 = vpop.f32.mrb[8].mxu1 }
0x180b   :  { %v1495_v8 = vadd.f32 %v1836_v7, %v1633_v6  ;;  %v1489_v9 = vpop.f32.mrb[9].mxu1 }
0x180c   :  { %v1490_v12 = vadd.f32 %v1633_v6, %v1489_v9 }
0x180d   :  { %v1577_v15 = vmul.f32 %v1544_v5, %v1495_v8 }
0x180e   :  { %v1576_v39 = vmul.f32 %v1539_v41, %v1490_v12  ;;  %v1839_v18 = vpop.f32.mrb[10].mxu1 }
0x180f   :  { %1585 = vst [vmem:[#allocation9 + $0x8] sm:$0xff] %v1577_v15  ;;  %v1505_v20 = vadd.f32 %v1839_v18, %v1633_v6  ;;  %v1499_v21 = vpop.f32.mrb[11].mxu1 }
0x1810   :  { %1584 = vst [vmem:[#allocation9] sm:$0xff] %v1576_v39  ;;  %v1500_v22 = vadd.f32 %v1633_v6, %v1499_v21 }
0x1811   :  { %v1579_v23 = vmul.f32 %v1554_v11, %v1505_v20 }
0x1812   :  { %v1578_v25 = vmul.f32 %v1549_v14, %v1500_v22  ;;  %v1842_v28 = vpop.f32.mrb[12].mxu1 }
0x1813   :  { %1587 = vst [vmem:[#allocation9 + $0x18] sm:$0xff] %v1579_v23  ;;  %v1515_v10 = vadd.f32 %v1842_v28, %v1633_v6  ;;  %v1509_v46 = vpop.f32.mrb[13].mxu1 }
0x1814   :  { %1586 = vst [vmem:[#allocation9 + $0x10] sm:$0xff] %v1578_v25  ;;  %v1510_v29 = vadd.f32 %v1633_v6, %v1509_v46 }
0x1815   :  { %v1581_v43 = vmul.f32 %v1564_v24, %v1515_v10 }
0x1816   :  { %v1580_v16 = vmul.f32 %v1559_v27, %v1510_v29  ;;  %v1845_v31 = vpop.f32.mrb[14].mxu1 }
0x1817   :  { %1589 = vst [vmem:[#allocation9 + $0x28] sm:$0xff] %v1581_v43  ;;  %v1525_v4 = vadd.f32 %v1845_v31, %v1633_v6  ;;  %v1519_v53 = vpop.f32.mrb[15].mxu1 }
0x1818   :  { %1588 = vst [vmem:[#allocation9 + $0x20] sm:$0xff] %v1580_v16  ;;  %v1520_v34 = vadd.f32 %v1633_v6, %v1519_v53 }
0x1819   :  { %v1583_v44 = vmul.f32 %v1574_v32, %v1525_v4 }
0x181a   :  { %v1582_v0 = vmul.f32 %v1569_v26, %v1520_v34 }
0x181b   :  { %1591 = vst [vmem:[#allocation9 + $0x38] sm:$0xff] %v1583_v44 }
0x181c   :  { %1590 = vst [vmem:[#allocation9 + $0x30] sm:$0xff] %v1582_v0 }
0x181d   :  { %2030 = shalt.err (!%p2027_p12)
}
0x181e   :  { %s2031_s30 = scalar_lea.hbm %s2518_s8, 1024 }
0x181f   :  { %p2032_p13 = scmp.ne.s32.totalorder %s2518_s8, %s2031_s30  ;;  %p2035_p0 = scmp.lt.u32.totalorder %s2031_s30, %s2518_s8 }
0x1821   :  { %p2037_p1 = pnand %p2035_p0, %p2032_p13 }
0x1823   :  { %2040 = shalt.err (!%p2037_p1)
}
0x1824   :  { %1603 = dma.vmem_to_hbm [thread:$0]  %s1598_s26, 1024, %s2518_s8, [#allocation8], %s2046_s15, %s2046_s15, %s2047_s16  }
0x1825   :  { %2043 = dma.done.wait [#allocation8], 1024  }
0x1826   :  { %2044 = vsyncadd [#allocation8], 4294966272 }
0x1827   :  { %1607 = vsyncpa [#allocation7], 1 }
0x1828   :  { %1608 = vsyncpa [#allocation8], 1 }

</bundles_post_ra>
